<compile_context>
chip_gen: v7x
topology: tpu7x:2x2x1
jax: 0.10.0
libtpu: 0.0.40
codegen_flags: <defaults>
</compile_context>

<pallas_src>
import jax
import jax.numpy as jnp
import numpy as np
from jax import lax
from jax.experimental import pallas as pl
from jax.experimental.pallas import tpu as pltpu

# ----------------------------- hyperparameters ------------------------------
NUM_BLOCKS = 2      # num_blocks
HEAD_SIZE = 32      # total MHA head size
N_HEADS = 4         # number of heads  -> per-head dim = 8
EMB_SIZE = 32       # emb_size
BLOCK_SIZE = 8      # block_size (T)
VOCAB_SIZE = 16     # data_generator.vocab_size
BATCH = 2
HEAD_DIM = HEAD_SIZE // N_HEADS
LN_EPS = 1e-5
V_PAD = 128         # LM-head lane padding -> lane-dense output stores


# --------------------------------- kernel -----------------------------------
def _layernorm(h, w, b):
    mu = jnp.mean(h, axis=-1, keepdims=True)
    var = jnp.mean((h - mu) ** 2, axis=-1, keepdims=True)
    return (h - mu) * lax.rsqrt(var + LN_EPS) * w + b


def gpt_kernel(x_ref, lnw_ref, wqkv_ref, wproj_ref, w1_ref, w2_ref, bff_ref,
               wout_ref, bout_ref, out_ref):
    B, T, E = BATCH, BLOCK_SIZE, EMB_SIZE
    H, D, HS, L = N_HEADS, HEAD_DIM, HEAD_SIZE, NUM_BLOCKS
    scale = float(E) ** -0.5          # ScaledAttention scales by C**-0.5, C = emb_size

    x = x_ref[...]                    # (B*T, E) f32 residual stream

    # Additive causal mask, hoisted out of the layer/head loops.
    row = lax.broadcasted_iota(jnp.int32, (T, T), 0)
    col = lax.broadcasted_iota(jnp.int32, (T, T), 1)
    causal_add = jnp.where(row >= col, 0.0, -1e30).astype(jnp.float32)

    for l in range(L):
        lnl = lnw_ref[l]              # (4, E): ln1_w, ln1_b, ln2_w, ln2_b
        bffl = bff_ref[l]             # (3, 4E): bproj | b1 | b2 (padded)

        # --- Multi-Headed Attention (pre-LN, residual) ---
        h = _layernorm(x, lnl[0], lnl[1])
        qkv = jnp.dot(h.astype(jnp.bfloat16), wqkv_ref[l],
                      preferred_element_type=jnp.float32)       # (B*T, 3*HS)
        qkv = qkv.astype(jnp.bfloat16)                           # score/AV operands
        head_rows = []
        for b in range(B):
            r0 = b * T
            outs = []
            for hh in range(H):
                q = qkv[r0:r0 + T, hh * D:(hh + 1) * D]
                k = qkv[r0:r0 + T, HS + hh * D:HS + (hh + 1) * D]
                v = qkv[r0:r0 + T, 2 * HS + hh * D:2 * HS + (hh + 1) * D]
                wei = lax.dot_general(                           # q @ k^T, transpose folded
                    q, k, (((1,), (1,)), ((), ())),
                    preferred_element_type=jnp.float32) * scale + causal_add
                wei = jax.nn.softmax(wei, axis=-1)
                outs.append(jnp.dot(wei.astype(jnp.bfloat16), v,
                                    preferred_element_type=jnp.float32))
            head_rows.append(jnp.concatenate(outs, axis=-1))     # (T, HS)
        head_out = jnp.concatenate(head_rows, axis=0)            # (B*T, HS)
        mha = jnp.dot(head_out.astype(jnp.bfloat16), wproj_ref[l],
                      preferred_element_type=jnp.float32) + bffl[0, :E]
        x = x + mha

        # --- FeedForward (pre-LN, residual) ---
        h2 = _layernorm(x, lnl[2], lnl[3])
        f = jnp.dot(h2.astype(jnp.bfloat16), w1_ref[l],
                    preferred_element_type=jnp.float32) + bffl[1]
        f = jnp.maximum(f, 0.0)
        f = jnp.dot(f.astype(jnp.bfloat16), w2_ref[l],
                    preferred_element_type=jnp.float32) + bffl[2, :E]
        x = x + f

    # --- final LayerNorm + LM head (padded to 128 lanes: unmasked lane-dense store) ---
    lnf = lnw_ref[L]
    xf = _layernorm(x, lnf[0], lnf[1])
    out_ref[...] = jnp.dot(xf.astype(jnp.bfloat16), wout_ref[...],
                           preferred_element_type=jnp.float32) + bout_ref[0]


# -------------------------------- wrapper ------------------------------------
def gpt_forward_pallas(tokens, packed):
    B, T = tokens.shape
    E, V = EMB_SIZE, VOCAB_SIZE
    BT = B * T

    # Glue (embedding gather + flatten) stays in plain JAX.
    x0 = (packed["tok_emb"][tokens] + packed["pos_emb"][:T][None]).astype(jnp.float32)
    x0 = x0.reshape(BT, E)

    weights = [packed["lnw"], packed["wqkv"], packed["wproj"], packed["w1"],
               packed["w2"], packed["bff"], packed["wout_p"], packed["bout_p"]]

    def full_spec(a):
        nd = a.ndim
        return pl.BlockSpec(a.shape, lambda i, _nd=nd: (0,) * _nd)

    in_specs = [full_spec(x0)] + [full_spec(w) for w in weights]
    out_spec = pl.BlockSpec((BT, V_PAD), lambda i: (0, 0))

    out = pl.pallas_call(
        gpt_kernel,
        out_shape=jax.ShapeDtypeStruct((BT, V_PAD), jnp.float32),
        grid_spec=pltpu.PrefetchScalarGridSpec(
            num_scalar_prefetch=0,
            grid=(1,),                 # single invocation: whole batch in one step
            in_specs=in_specs,
            out_specs=out_spec,
        ),
        compiler_params=pltpu.CompilerParams(
            dimension_semantics=("arbitrary",)),
    )(x0, *weights)
    # TODO(synk): on v7x (2 TensorCores) shard the batch across cores via
    # CORE_PARALLEL / pl.core_map instead of the single-step grid used here.
    return out[:, :V].reshape(B, T, V)


# -------------------------------- param init ---------------------------------
def init_params(key):
    E, V, T = EMB_SIZE, VOCAB_SIZE, BLOCK_SIZE
    L, H, D, HS = NUM_BLOCKS, N_HEADS, HEAD_DIM, HEAD_SIZE
    keys = jax.random.split(key, 16)
    norm = lambda k, shape, s=0.02: (s * jax.random.normal(k, shape)).astype(jnp.float32)
    return {
        "tok_emb": norm(keys[0], (V, E)),
        "pos_emb": norm(keys[1], (T, E)),
        "ln1_w": jnp.ones((L, E), jnp.float32),
        "ln1_b": jnp.zeros((L, E), jnp.float32),
        "wq": norm(keys[2], (L, H, E, D)),
        "wk": norm(keys[3], (L, H, E, D)),
        "wv": norm(keys[4], (L, H, E, D)),
        "wproj": norm(keys[5], (L, HS, E)),
        "bproj": norm(keys[6], (L, E)),
        "ln2_w": jnp.ones((L, E), jnp.float32),
        "ln2_b": jnp.zeros((L, E), jnp.float32),
        "w1": norm(keys[7], (L, E, 4 * E)),
        "b1": norm(keys[8], (L, 4 * E)),
        "w2": norm(keys[9], (L, 4 * E, E)),
        "b2": norm(keys[10], (L, E)),
        "lnf_w": jnp.ones((E,), jnp.float32),
        "lnf_b": jnp.zeros((E,), jnp.float32),
        "wout": norm(keys[11], (E, V)),
        "bout": norm(keys[12], (V,)),
    }


def pack_params(p):
    E, V = EMB_SIZE, VOCAB_SIZE
    L, H, D, HS = NUM_BLOCKS, N_HEADS, HEAD_DIM, HEAD_SIZE
    # LayerNorm params packed: (L+1, 4, E); slot L holds the final LN in rows 0/1.
    lnw = jnp.zeros((L + 1, 4, E), jnp.float32)
    lnw = lnw.at[:L, 0].set(p["ln1_w"]).at[:L, 1].set(p["ln1_b"])
    lnw = lnw.at[:L, 2].set(p["ln2_w"]).at[:L, 3].set(p["ln2_b"])
    lnw = lnw.at[L, 0].set(p["lnf_w"]).at[L, 1].set(p["lnf_b"])
    # Fused QKV weight: per layer [concat_h(wq) | concat_h(wk) | concat_h(wv)] -> (E, 3*HS).
    to_cat = lambda w: jnp.transpose(w, (0, 2, 1, 3)).reshape(L, E, HS)
    wqkv = jnp.concatenate([to_cat(p["wq"]), to_cat(p["wk"]), to_cat(p["wv"])], axis=-1)
    # Packed biases: (L, 3, 4E) — row 0 = bproj (padded), row 1 = b1, row 2 = b2 (padded).
    bff = jnp.zeros((L, 3, 4 * E), jnp.float32)
    bff = bff.at[:, 0, :E].set(p["bproj"]).at[:, 1, :].set(p["b1"]).at[:, 2, :E].set(p["b2"])
    # LM head padded to 128 lanes for lane-dense output stores.
    wout_p = jnp.zeros((E, V_PAD), jnp.float32).at[:, :V].set(p["wout"])
    bout_p = jnp.zeros((1, V_PAD), jnp.float32).at[0, :V].set(p["bout"])
    return {
        "tok_emb": p["tok_emb"],
        "pos_emb": p["pos_emb"],
        "lnw": lnw,
        "wqkv": wqkv.astype(jnp.bfloat16),
        "wproj": p["wproj"].astype(jnp.bfloat16),
        "w1": p["w1"].astype(jnp.bfloat16),
        "w2": p["w2"].astype(jnp.bfloat16),
        "bff": bff,
        "wout_p": wout_p.astype(jnp.bfloat16),
        "bout_p": bout_p,
    }


# ------------------------- pure-JAX reference (check) ------------------------
def gpt_forward_ref(tokens, packed):
    """f32 reference using the same bf16-rounded matmul weights as the kernel."""
    B, T = tokens.shape
    E, V = EMB_SIZE, VOCAB_SIZE
    L, H, D, HS = NUM_BLOCKS, N_HEADS, HEAD_DIM, HEAD_SIZE
    f32 = lambda a: a.astype(jnp.float32)
    x = f32(packed["tok_emb"][tokens] + packed["pos_emb"][:T][None])     # (B, T, E)
    scale = float(E) ** -0.5
    mask = np.tril(np.ones((T, T), dtype=bool))
    lnw, bff = packed["lnw"], packed["bff"]
    for l in range(L):
        h = _layernorm(x, lnw[l, 0], lnw[l, 1])
        qkv = h @ f32(packed["wqkv"][l])                                 # (B, T, 3*HS)
        outs = []
        for hh in range(H):
            q = qkv[..., hh * D:(hh + 1) * D]
            k = qkv[..., HS + hh * D:HS + (hh + 1) * D]
            v = qkv[..., 2 * HS + hh * D:2 * HS + (hh + 1) * D]
            wei = jnp.einsum("btd,bsd->bts", q, k) * scale
            wei = jnp.where(mask, wei, -jnp.inf)
            wei = jax.nn.softmax(wei, axis=-1)
            outs.append(wei @ v)
        head_out = jnp.concatenate(outs, axis=-1)                        # (B, T, HS)
        x = x + head_out @ f32(packed["wproj"][l]) + bff[l, 0, :E]
        h2 = _layernorm(x, lnw[l, 2], lnw[l, 3])
        f = jnp.maximum(h2 @ f32(packed["w1"][l]) + bff[l, 1], 0.0)
        x = x + f @ f32(packed["w2"][l]) + bff[l, 2, :E]
    xf = _layernorm(x, lnw[L, 0], lnw[L, 1])
    return xf @ f32(packed["wout_p"][:, :V]) + packed["bout_p"][0, :V]


# ----------------------------------- main -------------------------------------
if __name__ == "__main__":
    key = jax.random.PRNGKey(0)
    pkey, tkey = jax.random.split(key)
    packed = pack_params(init_params(pkey))
    tokens = jax.random.randint(tkey, (BATCH, BLOCK_SIZE), 0, VOCAB_SIZE, dtype=jnp.int32)

    logits = gpt_forward_pallas(tokens, packed)
    jax.block_until_ready(logits)

    ref = gpt_forward_ref(tokens, packed)
    # Kernel uses bf16 matmul operands with f32 accumulation; reference uses the same
    # bf16-rounded weights in f32 compute, so the tolerance only covers activation
    # rounding at the MXU inputs.
    np.testing.assert_allclose(np.asarray(logits), np.asarray(ref), rtol=1e-2, atol=2e-3)

    assert logits.shape == (BATCH, BLOCK_SIZE, VOCAB_SIZE)
    print("KERNEL_OK")
</pallas_src>

<mosaic_0001>
module attributes {stable_mosaic.version = 11 : i64} {
  func.func @gpt_kernel(%arg0: i32, %arg1: memref<16x32xf32, #tpu.memory_space<vmem>>, %arg2: memref<3x4x32xf32, #tpu.memory_space<vmem>>, %arg3: memref<2x32x96xbf16, #tpu.memory_space<vmem>>, %arg4: memref<2x32x32xbf16, #tpu.memory_space<vmem>>, %arg5: memref<2x32x128xbf16, #tpu.memory_space<vmem>>, %arg6: memref<2x128x32xbf16, #tpu.memory_space<vmem>>, %arg7: memref<2x3x128xf32, #tpu.memory_space<vmem>>, %arg8: memref<32x128xbf16, #tpu.memory_space<vmem>>, %arg9: memref<1x128xf32, #tpu.memory_space<vmem>>, %arg10: memref<16x128xf32, #tpu.memory_space<vmem>>) attributes {dimension_semantics = [#tpu.dimension_semantics<arbitrary>], iteration_bounds = array<i64: 1>, scalar_prefetch = 0 : i64, scratch_operands = 0 : i64, tpu.core_type = #tpu.core_type<tc>, window_params = [{pipeline_mode = #tpu.pipeline_mode<synchronous>, transform_indices = @transform_0, window_bounds = array<i64: 16, 32>}, {pipeline_mode = #tpu.pipeline_mode<synchronous>, transform_indices = @transform_1, window_bounds = array<i64: 3, 4, 32>}, {pipeline_mode = #tpu.pipeline_mode<synchronous>, transform_indices = @transform_2, window_bounds = array<i64: 2, 32, 96>}, {pipeline_mode = #tpu.pipeline_mode<synchronous>, transform_indices = @transform_3, window_bounds = array<i64: 2, 32, 32>}, {pipeline_mode = #tpu.pipeline_mode<synchronous>, transform_indices = @transform_4, window_bounds = array<i64: 2, 32, 128>}, {pipeline_mode = #tpu.pipeline_mode<synchronous>, transform_indices = @transform_5, window_bounds = array<i64: 2, 128, 32>}, {pipeline_mode = #tpu.pipeline_mode<synchronous>, transform_indices = @transform_6, window_bounds = array<i64: 2, 3, 128>}, {pipeline_mode = #tpu.pipeline_mode<synchronous>, transform_indices = @transform_7, window_bounds = array<i64: 32, 128>}, {pipeline_mode = #tpu.pipeline_mode<synchronous>, transform_indices = @transform_8, window_bounds = array<i64: 1, 128>}, {pipeline_mode = #tpu.pipeline_mode<synchronous>, transform_indices = @transform_9, window_bounds = array<i64: 16, 128>}]} {
    %c0 = arith.constant 0 : index
    %c0_0 = arith.constant 0 : index
    %0 = vector.load %arg1[%c0, %c0_0] : memref<16x32xf32, #tpu.memory_space<vmem>>, vector<16x32xf32>
    %1 = tpu.iota {dimensions = array<i32: 0>} : vector<8x8xi32>
    %2 = tpu.iota {dimensions = array<i32: 1>} : vector<8x8xi32>
    %3 = arith.cmpi sge, %1, %2 : vector<8x8xi32>
    %cst = arith.constant 0.000000e+00 : f32
    %cst_1 = arith.constant -1.000000e+30 : f32
    %4 = vector.broadcast %cst : f32 to vector<8x8xf32>
    %5 = vector.broadcast %cst_1 : f32 to vector<8x8xf32>
    %6 = arith.select %3, %4, %5 : vector<8x8xi1>, vector<8x8xf32>
    %c0_2 = arith.constant 0 : index
    %c0_3 = arith.constant 0 : index
    %c0_4 = arith.constant 0 : index
    %7 = vector.load %arg2[%c0_2, %c0_3, %c0_4] : memref<3x4x32xf32, #tpu.memory_space<vmem>>, vector<1x4x32xf32>
    %8 = vector.shape_cast %7 : vector<1x4x32xf32> to vector<4x32xf32>
    %c0_5 = arith.constant 0 : index
    %c0_6 = arith.constant 0 : index
    %c0_7 = arith.constant 0 : index
    %9 = vector.load %arg7[%c0_5, %c0_6, %c0_7] : memref<2x3x128xf32, #tpu.memory_space<vmem>>, vector<1x3x128xf32>
    %10 = vector.shape_cast %9 : vector<1x3x128xf32> to vector<3x128xf32>
    %11 = vector.extract_strided_slice %8 {offsets = [0, 0], sizes = [1, 32], strides = [1, 1]} : vector<4x32xf32> to vector<1x32xf32>
    %12 = vector.shape_cast %11 : vector<1x32xf32> to vector<32xf32>
    %13 = vector.extract_strided_slice %8 {offsets = [1, 0], sizes = [1, 32], strides = [1, 1]} : vector<4x32xf32> to vector<1x32xf32>
    %14 = vector.shape_cast %13 : vector<1x32xf32> to vector<32xf32>
    %cst_8 = arith.constant dense<0.000000e+00> : vector<16xf32>
    %15 = vector.multi_reduction <add>, %0, %cst_8 [1] : vector<16x32xf32> to vector<16xf32>
    %16 = vector.shape_cast %15 : vector<16xf32> to vector<16x1xf32>
    %cst_9 = arith.constant 3.200000e+01 : f32
    %17 = vector.broadcast %cst_9 : f32 to vector<16x1xf32>
    %18 = arith.divf %16, %17 : vector<16x1xf32>
    %19 = vector.broadcast %18 : vector<16x1xf32> to vector<16x32xf32>
    %20 = arith.subf %0, %19 : vector<16x32xf32>
    %21 = arith.mulf %20, %20 : vector<16x32xf32>
    %cst_10 = arith.constant dense<0.000000e+00> : vector<16xf32>
    %22 = vector.multi_reduction <add>, %21, %cst_10 [1] : vector<16x32xf32> to vector<16xf32>
    %23 = vector.shape_cast %22 : vector<16xf32> to vector<16x1xf32>
    %cst_11 = arith.constant 3.200000e+01 : f32
    %24 = vector.broadcast %cst_11 : f32 to vector<16x1xf32>
    %25 = arith.divf %23, %24 : vector<16x1xf32>
    %26 = vector.broadcast %18 : vector<16x1xf32> to vector<16x32xf32>
    %27 = arith.subf %0, %26 : vector<16x32xf32>
    %cst_12 = arith.constant 9.99999974E-6 : f32
    %28 = vector.broadcast %cst_12 : f32 to vector<16x1xf32>
    %29 = arith.addf %25, %28 : vector<16x1xf32>
    %30 = math.rsqrt %29 : vector<16x1xf32>
    %31 = vector.broadcast %30 : vector<16x1xf32> to vector<16x32xf32>
    %32 = arith.mulf %27, %31 : vector<16x32xf32>
    %33 = vector.shape_cast %12 : vector<32xf32> to vector<1x32xf32>
    %34 = vector.broadcast %33 : vector<1x32xf32> to vector<16x32xf32>
    %35 = arith.mulf %32, %34 : vector<16x32xf32>
    %36 = vector.shape_cast %14 : vector<32xf32> to vector<1x32xf32>
    %37 = vector.broadcast %36 : vector<1x32xf32> to vector<16x32xf32>
    %38 = arith.addf %35, %37 : vector<16x32xf32>
    %39 = arith.truncf %38 : vector<16x32xf32> to vector<16x32xbf16>
    %c0_13 = arith.constant 0 : index
    %c0_14 = arith.constant 0 : index
    %c0_15 = arith.constant 0 : index
    %40 = vector.load %arg3[%c0_13, %c0_14, %c0_15] : memref<2x32x96xbf16, #tpu.memory_space<vmem>>, vector<1x32x96xbf16>
    %41 = vector.shape_cast %40 : vector<1x32x96xbf16> to vector<32x96xbf16>
    %cst_16 = arith.constant dense<0.000000e+00> : vector<16x96xf32>
    %42 = tpu.matmul %39, %41, %cst_16 {dimension_numbers = #tpu.dot_dimension_numbers<[1], [0], [0], [1], [0, 0, 1, 1], [], []>} : vector<16x32xbf16>, vector<32x96xbf16>, vector<16x96xf32> -> vector<16x96xf32>
    %43 = arith.truncf %42 : vector<16x96xf32> to vector<16x96xbf16>
    %44 = vector.extract_strided_slice %43 {offsets = [0, 0], sizes = [8, 8], strides = [1, 1]} : vector<16x96xbf16> to vector<8x8xbf16>
    %45 = vector.extract_strided_slice %43 {offsets = [0, 32], sizes = [8, 8], strides = [1, 1]} : vector<16x96xbf16> to vector<8x8xbf16>
    %46 = vector.extract_strided_slice %43 {offsets = [0, 64], sizes = [8, 8], strides = [1, 1]} : vector<16x96xbf16> to vector<8x8xbf16>
    %cst_17 = arith.constant dense<0.000000e+00> : vector<8x8xf32>
    %47 = tpu.matmul %44, %45, %cst_17 {dimension_numbers = #tpu.dot_dimension_numbers<[1], [1], [0], [0], [0, 0, 1, 0], [], []>} : vector<8x8xbf16>, vector<8x8xbf16>, vector<8x8xf32> -> vector<8x8xf32>
    %cst_18 = arith.constant 0.176776692 : f32
    %48 = vector.broadcast %cst_18 : f32 to vector<8x8xf32>
    %49 = arith.mulf %47, %48 : vector<8x8xf32>
    %50 = arith.addf %49, %6 : vector<8x8xf32>
    %cst_19 = arith.constant dense<0xFF800000> : vector<8xf32>
    %51 = vector.multi_reduction <maximumf>, %50, %cst_19 [1] : vector<8x8xf32> to vector<8xf32>
    %cst_20 = arith.constant 0xFF800000 : f32
    %52 = vector.broadcast %cst_20 : f32 to vector<8xf32>
    %53 = arith.maximumf %52, %51 : vector<8xf32>
    %54 = vector.shape_cast %53 : vector<8xf32> to vector<8x1xf32>
    %55 = vector.broadcast %54 : vector<8x1xf32> to vector<8x8xf32>
    %56 = arith.subf %50, %55 : vector<8x8xf32>
    %57 = math.exp %56 : vector<8x8xf32>
    %cst_21 = arith.constant dense<0.000000e+00> : vector<8xf32>
    %58 = vector.multi_reduction <add>, %57, %cst_21 [1] : vector<8x8xf32> to vector<8xf32>
    %59 = vector.shape_cast %58 : vector<8xf32> to vector<8x1xf32>
    %60 = vector.broadcast %59 : vector<8x1xf32> to vector<8x8xf32>
    %61 = arith.divf %57, %60 : vector<8x8xf32>
    %62 = arith.truncf %61 : vector<8x8xf32> to vector<8x8xbf16>
    %cst_22 = arith.constant dense<0.000000e+00> : vector<8x8xf32>
    %63 = tpu.matmul %62, %46, %cst_22 {dimension_numbers = #tpu.dot_dimension_numbers<[1], [0], [0], [1], [0, 0, 1, 1], [], []>} : vector<8x8xbf16>, vector<8x8xbf16>, vector<8x8xf32> -> vector<8x8xf32>
    %64 = vector.extract_strided_slice %43 {offsets = [0, 8], sizes = [8, 8], strides = [1, 1]} : vector<16x96xbf16> to vector<8x8xbf16>
    %65 = vector.extract_strided_slice %43 {offsets = [0, 40], sizes = [8, 8], strides = [1, 1]} : vector<16x96xbf16> to vector<8x8xbf16>
    %66 = vector.extract_strided_slice %43 {offsets = [0, 72], sizes = [8, 8], strides = [1, 1]} : vector<16x96xbf16> to vector<8x8xbf16>
    %cst_23 = arith.constant dense<0.000000e+00> : vector<8x8xf32>
    %67 = tpu.matmul %64, %65, %cst_23 {dimension_numbers = #tpu.dot_dimension_numbers<[1], [1], [0], [0], [0, 0, 1, 0], [], []>} : vector<8x8xbf16>, vector<8x8xbf16>, vector<8x8xf32> -> vector<8x8xf32>
    %cst_24 = arith.constant 0.176776692 : f32
    %68 = vector.broadcast %cst_24 : f32 to vector<8x8xf32>
    %69 = arith.mulf %67, %68 : vector<8x8xf32>
    %70 = arith.addf %69, %6 : vector<8x8xf32>
    %cst_25 = arith.constant dense<0xFF800000> : vector<8xf32>
    %71 = vector.multi_reduction <maximumf>, %70, %cst_25 [1] : vector<8x8xf32> to vector<8xf32>
    %cst_26 = arith.constant 0xFF800000 : f32
    %72 = vector.broadcast %cst_26 : f32 to vector<8xf32>
    %73 = arith.maximumf %72, %71 : vector<8xf32>
    %74 = vector.shape_cast %73 : vector<8xf32> to vector<8x1xf32>
    %75 = vector.broadcast %74 : vector<8x1xf32> to vector<8x8xf32>
    %76 = arith.subf %70, %75 : vector<8x8xf32>
    %77 = math.exp %76 : vector<8x8xf32>
    %cst_27 = arith.constant dense<0.000000e+00> : vector<8xf32>
    %78 = vector.multi_reduction <add>, %77, %cst_27 [1] : vector<8x8xf32> to vector<8xf32>
    %79 = vector.shape_cast %78 : vector<8xf32> to vector<8x1xf32>
    %80 = vector.broadcast %79 : vector<8x1xf32> to vector<8x8xf32>
    %81 = arith.divf %77, %80 : vector<8x8xf32>
    %82 = arith.truncf %81 : vector<8x8xf32> to vector<8x8xbf16>
    %cst_28 = arith.constant dense<0.000000e+00> : vector<8x8xf32>
    %83 = tpu.matmul %82, %66, %cst_28 {dimension_numbers = #tpu.dot_dimension_numbers<[1], [0], [0], [1], [0, 0, 1, 1], [], []>} : vector<8x8xbf16>, vector<8x8xbf16>, vector<8x8xf32> -> vector<8x8xf32>
    %84 = vector.extract_strided_slice %43 {offsets = [0, 16], sizes = [8, 8], strides = [1, 1]} : vector<16x96xbf16> to vector<8x8xbf16>
    %85 = vector.extract_strided_slice %43 {offsets = [0, 48], sizes = [8, 8], strides = [1, 1]} : vector<16x96xbf16> to vector<8x8xbf16>
    %86 = vector.extract_strided_slice %43 {offsets = [0, 80], sizes = [8, 8], strides = [1, 1]} : vector<16x96xbf16> to vector<8x8xbf16>
    %cst_29 = arith.constant dense<0.000000e+00> : vector<8x8xf32>
    %87 = tpu.matmul %84, %85, %cst_29 {dimension_numbers = #tpu.dot_dimension_numbers<[1], [1], [0], [0], [0, 0, 1, 0], [], []>} : vector<8x8xbf16>, vector<8x8xbf16>, vector<8x8xf32> -> vector<8x8xf32>
    %cst_30 = arith.constant 0.176776692 : f32
    %88 = vector.broadcast %cst_30 : f32 to vector<8x8xf32>
    %89 = arith.mulf %87, %88 : vector<8x8xf32>
    %90 = arith.addf %89, %6 : vector<8x8xf32>
    %cst_31 = arith.constant dense<0xFF800000> : vector<8xf32>
    %91 = vector.multi_reduction <maximumf>, %90, %cst_31 [1] : vector<8x8xf32> to vector<8xf32>
    %cst_32 = arith.constant 0xFF800000 : f32
    %92 = vector.broadcast %cst_32 : f32 to vector<8xf32>
    %93 = arith.maximumf %92, %91 : vector<8xf32>
    %94 = vector.shape_cast %93 : vector<8xf32> to vector<8x1xf32>
    %95 = vector.broadcast %94 : vector<8x1xf32> to vector<8x8xf32>
    %96 = arith.subf %90, %95 : vector<8x8xf32>
    %97 = math.exp %96 : vector<8x8xf32>
    %cst_33 = arith.constant dense<0.000000e+00> : vector<8xf32>
    %98 = vector.multi_reduction <add>, %97, %cst_33 [1] : vector<8x8xf32> to vector<8xf32>
    %99 = vector.shape_cast %98 : vector<8xf32> to vector<8x1xf32>
    %100 = vector.broadcast %99 : vector<8x1xf32> to vector<8x8xf32>
    %101 = arith.divf %97, %100 : vector<8x8xf32>
    %102 = arith.truncf %101 : vector<8x8xf32> to vector<8x8xbf16>
    %cst_34 = arith.constant dense<0.000000e+00> : vector<8x8xf32>
    %103 = tpu.matmul %102, %86, %cst_34 {dimension_numbers = #tpu.dot_dimension_numbers<[1], [0], [0], [1], [0, 0, 1, 1], [], []>} : vector<8x8xbf16>, vector<8x8xbf16>, vector<8x8xf32> -> vector<8x8xf32>
    %104 = vector.extract_strided_slice %43 {offsets = [0, 24], sizes = [8, 8], strides = [1, 1]} : vector<16x96xbf16> to vector<8x8xbf16>
    %105 = vector.extract_strided_slice %43 {offsets = [0, 56], sizes = [8, 8], strides = [1, 1]} : vector<16x96xbf16> to vector<8x8xbf16>
    %106 = vector.extract_strided_slice %43 {offsets = [0, 88], sizes = [8, 8], strides = [1, 1]} : vector<16x96xbf16> to vector<8x8xbf16>
    %cst_35 = arith.constant dense<0.000000e+00> : vector<8x8xf32>
    %107 = tpu.matmul %104, %105, %cst_35 {dimension_numbers = #tpu.dot_dimension_numbers<[1], [1], [0], [0], [0, 0, 1, 0], [], []>} : vector<8x8xbf16>, vector<8x8xbf16>, vector<8x8xf32> -> vector<8x8xf32>
    %cst_36 = arith.constant 0.176776692 : f32
    %108 = vector.broadcast %cst_36 : f32 to vector<8x8xf32>
    %109 = arith.mulf %107, %108 : vector<8x8xf32>
    %110 = arith.addf %109, %6 : vector<8x8xf32>
    %cst_37 = arith.constant dense<0xFF800000> : vector<8xf32>
    %111 = vector.multi_reduction <maximumf>, %110, %cst_37 [1] : vector<8x8xf32> to vector<8xf32>
    %cst_38 = arith.constant 0xFF800000 : f32
    %112 = vector.broadcast %cst_38 : f32 to vector<8xf32>
    %113 = arith.maximumf %112, %111 : vector<8xf32>
    %114 = vector.shape_cast %113 : vector<8xf32> to vector<8x1xf32>
    %115 = vector.broadcast %114 : vector<8x1xf32> to vector<8x8xf32>
    %116 = arith.subf %110, %115 : vector<8x8xf32>
    %117 = math.exp %116 : vector<8x8xf32>
    %cst_39 = arith.constant dense<0.000000e+00> : vector<8xf32>
    %118 = vector.multi_reduction <add>, %117, %cst_39 [1] : vector<8x8xf32> to vector<8xf32>
    %119 = vector.shape_cast %118 : vector<8xf32> to vector<8x1xf32>
    %120 = vector.broadcast %119 : vector<8x1xf32> to vector<8x8xf32>
    %121 = arith.divf %117, %120 : vector<8x8xf32>
    %122 = arith.truncf %121 : vector<8x8xf32> to vector<8x8xbf16>
    %cst_40 = arith.constant dense<0.000000e+00> : vector<8x8xf32>
    %123 = tpu.matmul %122, %106, %cst_40 {dimension_numbers = #tpu.dot_dimension_numbers<[1], [0], [0], [1], [0, 0, 1, 1], [], []>} : vector<8x8xbf16>, vector<8x8xbf16>, vector<8x8xf32> -> vector<8x8xf32>
    %124 = tpu.concatenate %63, %83, %103, %123 in 1 : vector<8x8xf32>, vector<8x8xf32>, vector<8x8xf32>, vector<8x8xf32> -> vector<8x32xf32>
    %125 = vector.extract_strided_slice %43 {offsets = [8, 0], sizes = [8, 8], strides = [1, 1]} : vector<16x96xbf16> to vector<8x8xbf16>
    %126 = vector.extract_strided_slice %43 {offsets = [8, 32], sizes = [8, 8], strides = [1, 1]} : vector<16x96xbf16> to vector<8x8xbf16>
    %127 = vector.extract_strided_slice %43 {offsets = [8, 64], sizes = [8, 8], strides = [1, 1]} : vector<16x96xbf16> to vector<8x8xbf16>
    %cst_41 = arith.constant dense<0.000000e+00> : vector<8x8xf32>
    %128 = tpu.matmul %125, %126, %cst_41 {dimension_numbers = #tpu.dot_dimension_numbers<[1], [1], [0], [0], [0, 0, 1, 0], [], []>} : vector<8x8xbf16>, vector<8x8xbf16>, vector<8x8xf32> -> vector<8x8xf32>
    %cst_42 = arith.constant 0.176776692 : f32
    %129 = vector.broadcast %cst_42 : f32 to vector<8x8xf32>
    %130 = arith.mulf %128, %129 : vector<8x8xf32>
    %131 = arith.addf %130, %6 : vector<8x8xf32>
    %cst_43 = arith.constant dense<0xFF800000> : vector<8xf32>
    %132 = vector.multi_reduction <maximumf>, %131, %cst_43 [1] : vector<8x8xf32> to vector<8xf32>
    %cst_44 = arith.constant 0xFF800000 : f32
    %133 = vector.broadcast %cst_44 : f32 to vector<8xf32>
    %134 = arith.maximumf %133, %132 : vector<8xf32>
    %135 = vector.shape_cast %134 : vector<8xf32> to vector<8x1xf32>
    %136 = vector.broadcast %135 : vector<8x1xf32> to vector<8x8xf32>
    %137 = arith.subf %131, %136 : vector<8x8xf32>
    %138 = math.exp %137 : vector<8x8xf32>
    %cst_45 = arith.constant dense<0.000000e+00> : vector<8xf32>
    %139 = vector.multi_reduction <add>, %138, %cst_45 [1] : vector<8x8xf32> to vector<8xf32>
    %140 = vector.shape_cast %139 : vector<8xf32> to vector<8x1xf32>
    %141 = vector.broadcast %140 : vector<8x1xf32> to vector<8x8xf32>
    %142 = arith.divf %138, %141 : vector<8x8xf32>
    %143 = arith.truncf %142 : vector<8x8xf32> to vector<8x8xbf16>
    %cst_46 = arith.constant dense<0.000000e+00> : vector<8x8xf32>
    %144 = tpu.matmul %143, %127, %cst_46 {dimension_numbers = #tpu.dot_dimension_numbers<[1], [0], [0], [1], [0, 0, 1, 1], [], []>} : vector<8x8xbf16>, vector<8x8xbf16>, vector<8x8xf32> -> vector<8x8xf32>
    %145 = vector.extract_strided_slice %43 {offsets = [8, 8], sizes = [8, 8], strides = [1, 1]} : vector<16x96xbf16> to vector<8x8xbf16>
    %146 = vector.extract_strided_slice %43 {offsets = [8, 40], sizes = [8, 8], strides = [1, 1]} : vector<16x96xbf16> to vector<8x8xbf16>
    %147 = vector.extract_strided_slice %43 {offsets = [8, 72], sizes = [8, 8], strides = [1, 1]} : vector<16x96xbf16> to vector<8x8xbf16>
    %cst_47 = arith.constant dense<0.000000e+00> : vector<8x8xf32>
    %148 = tpu.matmul %145, %146, %cst_47 {dimension_numbers = #tpu.dot_dimension_numbers<[1], [1], [0], [0], [0, 0, 1, 0], [], []>} : vector<8x8xbf16>, vector<8x8xbf16>, vector<8x8xf32> -> vector<8x8xf32>
    %cst_48 = arith.constant 0.176776692 : f32
    %149 = vector.broadcast %cst_48 : f32 to vector<8x8xf32>
    %150 = arith.mulf %148, %149 : vector<8x8xf32>
    %151 = arith.addf %150, %6 : vector<8x8xf32>
    %cst_49 = arith.constant dense<0xFF800000> : vector<8xf32>
    %152 = vector.multi_reduction <maximumf>, %151, %cst_49 [1] : vector<8x8xf32> to vector<8xf32>
    %cst_50 = arith.constant 0xFF800000 : f32
    %153 = vector.broadcast %cst_50 : f32 to vector<8xf32>
    %154 = arith.maximumf %153, %152 : vector<8xf32>
    %155 = vector.shape_cast %154 : vector<8xf32> to vector<8x1xf32>
    %156 = vector.broadcast %155 : vector<8x1xf32> to vector<8x8xf32>
    %157 = arith.subf %151, %156 : vector<8x8xf32>
    %158 = math.exp %157 : vector<8x8xf32>
    %cst_51 = arith.constant dense<0.000000e+00> : vector<8xf32>
    %159 = vector.multi_reduction <add>, %158, %cst_51 [1] : vector<8x8xf32> to vector<8xf32>
    %160 = vector.shape_cast %159 : vector<8xf32> to vector<8x1xf32>
    %161 = vector.broadcast %160 : vector<8x1xf32> to vector<8x8xf32>
    %162 = arith.divf %158, %161 : vector<8x8xf32>
    %163 = arith.truncf %162 : vector<8x8xf32> to vector<8x8xbf16>
    %cst_52 = arith.constant dense<0.000000e+00> : vector<8x8xf32>
    %164 = tpu.matmul %163, %147, %cst_52 {dimension_numbers = #tpu.dot_dimension_numbers<[1], [0], [0], [1], [0, 0, 1, 1], [], []>} : vector<8x8xbf16>, vector<8x8xbf16>, vector<8x8xf32> -> vector<8x8xf32>
    %165 = vector.extract_strided_slice %43 {offsets = [8, 16], sizes = [8, 8], strides = [1, 1]} : vector<16x96xbf16> to vector<8x8xbf16>
    %166 = vector.extract_strided_slice %43 {offsets = [8, 48], sizes = [8, 8], strides = [1, 1]} : vector<16x96xbf16> to vector<8x8xbf16>
    %167 = vector.extract_strided_slice %43 {offsets = [8, 80], sizes = [8, 8], strides = [1, 1]} : vector<16x96xbf16> to vector<8x8xbf16>
    %cst_53 = arith.constant dense<0.000000e+00> : vector<8x8xf32>
    %168 = tpu.matmul %165, %166, %cst_53 {dimension_numbers = #tpu.dot_dimension_numbers<[1], [1], [0], [0], [0, 0, 1, 0], [], []>} : vector<8x8xbf16>, vector<8x8xbf16>, vector<8x8xf32> -> vector<8x8xf32>
    %cst_54 = arith.constant 0.176776692 : f32
    %169 = vector.broadcast %cst_54 : f32 to vector<8x8xf32>
    %170 = arith.mulf %168, %169 : vector<8x8xf32>
    %171 = arith.addf %170, %6 : vector<8x8xf32>
    %cst_55 = arith.constant dense<0xFF800000> : vector<8xf32>
    %172 = vector.multi_reduction <maximumf>, %171, %cst_55 [1] : vector<8x8xf32> to vector<8xf32>
    %cst_56 = arith.constant 0xFF800000 : f32
    %173 = vector.broadcast %cst_56 : f32 to vector<8xf32>
    %174 = arith.maximumf %173, %172 : vector<8xf32>
    %175 = vector.shape_cast %174 : vector<8xf32> to vector<8x1xf32>
    %176 = vector.broadcast %175 : vector<8x1xf32> to vector<8x8xf32>
    %177 = arith.subf %171, %176 : vector<8x8xf32>
    %178 = math.exp %177 : vector<8x8xf32>
    %cst_57 = arith.constant dense<0.000000e+00> : vector<8xf32>
    %179 = vector.multi_reduction <add>, %178, %cst_57 [1] : vector<8x8xf32> to vector<8xf32>
    %180 = vector.shape_cast %179 : vector<8xf32> to vector<8x1xf32>
    %181 = vector.broadcast %180 : vector<8x1xf32> to vector<8x8xf32>
    %182 = arith.divf %178, %181 : vector<8x8xf32>
    %183 = arith.truncf %182 : vector<8x8xf32> to vector<8x8xbf16>
    %cst_58 = arith.constant dense<0.000000e+00> : vector<8x8xf32>
    %184 = tpu.matmul %183, %167, %cst_58 {dimension_numbers = #tpu.dot_dimension_numbers<[1], [0], [0], [1], [0, 0, 1, 1], [], []>} : vector<8x8xbf16>, vector<8x8xbf16>, vector<8x8xf32> -> vector<8x8xf32>
    %185 = vector.extract_strided_slice %43 {offsets = [8, 24], sizes = [8, 8], strides = [1, 1]} : vector<16x96xbf16> to vector<8x8xbf16>
    %186 = vector.extract_strided_slice %43 {offsets = [8, 56], sizes = [8, 8], strides = [1, 1]} : vector<16x96xbf16> to vector<8x8xbf16>
    %187 = vector.extract_strided_slice %43 {offsets = [8, 88], sizes = [8, 8], strides = [1, 1]} : vector<16x96xbf16> to vector<8x8xbf16>
    %cst_59 = arith.constant dense<0.000000e+00> : vector<8x8xf32>
    %188 = tpu.matmul %185, %186, %cst_59 {dimension_numbers = #tpu.dot_dimension_numbers<[1], [1], [0], [0], [0, 0, 1, 0], [], []>} : vector<8x8xbf16>, vector<8x8xbf16>, vector<8x8xf32> -> vector<8x8xf32>
    %cst_60 = arith.constant 0.176776692 : f32
    %189 = vector.broadcast %cst_60 : f32 to vector<8x8xf32>
    %190 = arith.mulf %188, %189 : vector<8x8xf32>
    %191 = arith.addf %190, %6 : vector<8x8xf32>
    %cst_61 = arith.constant dense<0xFF800000> : vector<8xf32>
    %192 = vector.multi_reduction <maximumf>, %191, %cst_61 [1] : vector<8x8xf32> to vector<8xf32>
    %cst_62 = arith.constant 0xFF800000 : f32
    %193 = vector.broadcast %cst_62 : f32 to vector<8xf32>
    %194 = arith.maximumf %193, %192 : vector<8xf32>
    %195 = vector.shape_cast %194 : vector<8xf32> to vector<8x1xf32>
    %196 = vector.broadcast %195 : vector<8x1xf32> to vector<8x8xf32>
    %197 = arith.subf %191, %196 : vector<8x8xf32>
    %198 = math.exp %197 : vector<8x8xf32>
    %cst_63 = arith.constant dense<0.000000e+00> : vector<8xf32>
    %199 = vector.multi_reduction <add>, %198, %cst_63 [1] : vector<8x8xf32> to vector<8xf32>
    %200 = vector.shape_cast %199 : vector<8xf32> to vector<8x1xf32>
    %201 = vector.broadcast %200 : vector<8x1xf32> to vector<8x8xf32>
    %202 = arith.divf %198, %201 : vector<8x8xf32>
    %203 = arith.truncf %202 : vector<8x8xf32> to vector<8x8xbf16>
    %cst_64 = arith.constant dense<0.000000e+00> : vector<8x8xf32>
    %204 = tpu.matmul %203, %187, %cst_64 {dimension_numbers = #tpu.dot_dimension_numbers<[1], [0], [0], [1], [0, 0, 1, 1], [], []>} : vector<8x8xbf16>, vector<8x8xbf16>, vector<8x8xf32> -> vector<8x8xf32>
    %205 = tpu.concatenate %144, %164, %184, %204 in 1 : vector<8x8xf32>, vector<8x8xf32>, vector<8x8xf32>, vector<8x8xf32> -> vector<8x32xf32>
    %206 = tpu.concatenate %124, %205 in 0 : vector<8x32xf32>, vector<8x32xf32> -> vector<16x32xf32>
    %207 = arith.truncf %206 : vector<16x32xf32> to vector<16x32xbf16>
    %c0_65 = arith.constant 0 : index
    %c0_66 = arith.constant 0 : index
    %c0_67 = arith.constant 0 : index
    %208 = vector.load %arg4[%c0_65, %c0_66, %c0_67] : memref<2x32x32xbf16, #tpu.memory_space<vmem>>, vector<1x32x32xbf16>
    %209 = vector.shape_cast %208 : vector<1x32x32xbf16> to vector<32x32xbf16>
    %cst_68 = arith.constant dense<0.000000e+00> : vector<16x32xf32>
    %210 = tpu.matmul %207, %209, %cst_68 {dimension_numbers = #tpu.dot_dimension_numbers<[1], [0], [0], [1], [0, 0, 1, 1], [], []>} : vector<16x32xbf16>, vector<32x32xbf16>, vector<16x32xf32> -> vector<16x32xf32>
    %211 = vector.extract_strided_slice %10 {offsets = [0, 0], sizes = [1, 32], strides = [1, 1]} : vector<3x128xf32> to vector<1x32xf32>
    %212 = vector.shape_cast %211 : vector<1x32xf32> to vector<32xf32>
    %213 = vector.shape_cast %212 : vector<32xf32> to vector<1x32xf32>
    %214 = vector.broadcast %213 : vector<1x32xf32> to vector<16x32xf32>
    %215 = arith.addf %210, %214 : vector<16x32xf32>
    %216 = arith.addf %0, %215 : vector<16x32xf32>
    %217 = vector.extract_strided_slice %8 {offsets = [2, 0], sizes = [1, 32], strides = [1, 1]} : vector<4x32xf32> to vector<1x32xf32>
    %218 = vector.shape_cast %217 : vector<1x32xf32> to vector<32xf32>
    %219 = vector.extract_strided_slice %8 {offsets = [3, 0], sizes = [1, 32], strides = [1, 1]} : vector<4x32xf32> to vector<1x32xf32>
    %220 = vector.shape_cast %219 : vector<1x32xf32> to vector<32xf32>
    %cst_69 = arith.constant dense<0.000000e+00> : vector<16xf32>
    %221 = vector.multi_reduction <add>, %216, %cst_69 [1] : vector<16x32xf32> to vector<16xf32>
    %222 = vector.shape_cast %221 : vector<16xf32> to vector<16x1xf32>
    %cst_70 = arith.constant 3.200000e+01 : f32
    %223 = vector.broadcast %cst_70 : f32 to vector<16x1xf32>
    %224 = arith.divf %222, %223 : vector<16x1xf32>
    %225 = vector.broadcast %224 : vector<16x1xf32> to vector<16x32xf32>
    %226 = arith.subf %216, %225 : vector<16x32xf32>
    %227 = arith.mulf %226, %226 : vector<16x32xf32>
    %cst_71 = arith.constant dense<0.000000e+00> : vector<16xf32>
    %228 = vector.multi_reduction <add>, %227, %cst_71 [1] : vector<16x32xf32> to vector<16xf32>
    %229 = vector.shape_cast %228 : vector<16xf32> to vector<16x1xf32>
    %cst_72 = arith.constant 3.200000e+01 : f32
    %230 = vector.broadcast %cst_72 : f32 to vector<16x1xf32>
    %231 = arith.divf %229, %230 : vector<16x1xf32>
    %232 = vector.broadcast %224 : vector<16x1xf32> to vector<16x32xf32>
    %233 = arith.subf %216, %232 : vector<16x32xf32>
    %cst_73 = arith.constant 9.99999974E-6 : f32
    %234 = vector.broadcast %cst_73 : f32 to vector<16x1xf32>
    %235 = arith.addf %231, %234 : vector<16x1xf32>
    %236 = math.rsqrt %235 : vector<16x1xf32>
    %237 = vector.broadcast %236 : vector<16x1xf32> to vector<16x32xf32>
    %238 = arith.mulf %233, %237 : vector<16x32xf32>
    %239 = vector.shape_cast %218 : vector<32xf32> to vector<1x32xf32>
    %240 = vector.broadcast %239 : vector<1x32xf32> to vector<16x32xf32>
    %241 = arith.mulf %238, %240 : vector<16x32xf32>
    %242 = vector.shape_cast %220 : vector<32xf32> to vector<1x32xf32>
    %243 = vector.broadcast %242 : vector<1x32xf32> to vector<16x32xf32>
    %244 = arith.addf %241, %243 : vector<16x32xf32>
    %245 = arith.truncf %244 : vector<16x32xf32> to vector<16x32xbf16>
    %c0_74 = arith.constant 0 : index
    %c0_75 = arith.constant 0 : index
    %c0_76 = arith.constant 0 : index
    %246 = vector.load %arg5[%c0_74, %c0_75, %c0_76] : memref<2x32x128xbf16, #tpu.memory_space<vmem>>, vector<1x32x128xbf16>
    %247 = vector.shape_cast %246 : vector<1x32x128xbf16> to vector<32x128xbf16>
    %cst_77 = arith.constant dense<0.000000e+00> : vector<16x128xf32>
    %248 = tpu.matmul %245, %247, %cst_77 {dimension_numbers = #tpu.dot_dimension_numbers<[1], [0], [0], [1], [0, 0, 1, 1], [], []>} : vector<16x32xbf16>, vector<32x128xbf16>, vector<16x128xf32> -> vector<16x128xf32>
    %249 = vector.extract_strided_slice %10 {offsets = [1, 0], sizes = [1, 128], strides = [1, 1]} : vector<3x128xf32> to vector<1x128xf32>
    %250 = vector.shape_cast %249 : vector<1x128xf32> to vector<128xf32>
    %251 = vector.shape_cast %250 : vector<128xf32> to vector<1x128xf32>
    %252 = vector.broadcast %251 : vector<1x128xf32> to vector<16x128xf32>
    %253 = arith.addf %248, %252 : vector<16x128xf32>
    %cst_78 = arith.constant 0.000000e+00 : f32
    %254 = vector.broadcast %cst_78 : f32 to vector<16x128xf32>
    %255 = arith.maximumf %253, %254 : vector<16x128xf32>
    %256 = arith.truncf %255 : vector<16x128xf32> to vector<16x128xbf16>
    %c0_79 = arith.constant 0 : index
    %c0_80 = arith.constant 0 : index
    %c0_81 = arith.constant 0 : index
    %257 = vector.load %arg6[%c0_79, %c0_80, %c0_81] : memref<2x128x32xbf16, #tpu.memory_space<vmem>>, vector<1x128x32xbf16>
    %258 = vector.shape_cast %257 : vector<1x128x32xbf16> to vector<128x32xbf16>
    %cst_82 = arith.constant dense<0.000000e+00> : vector<16x32xf32>
    %259 = tpu.matmul %256, %258, %cst_82 {dimension_numbers = #tpu.dot_dimension_numbers<[1], [0], [0], [1], [0, 0, 1, 1], [], []>} : vector<16x128xbf16>, vector<128x32xbf16>, vector<16x32xf32> -> vector<16x32xf32>
    %260 = vector.extract_strided_slice %10 {offsets = [2, 0], sizes = [1, 32], strides = [1, 1]} : vector<3x128xf32> to vector<1x32xf32>
    %261 = vector.shape_cast %260 : vector<1x32xf32> to vector<32xf32>
    %262 = vector.shape_cast %261 : vector<32xf32> to vector<1x32xf32>
    %263 = vector.broadcast %262 : vector<1x32xf32> to vector<16x32xf32>
    %264 = arith.addf %259, %263 : vector<16x32xf32>
    %265 = arith.addf %216, %264 : vector<16x32xf32>
    %c1 = arith.constant 1 : index
    %c0_83 = arith.constant 0 : index
    %c0_84 = arith.constant 0 : index
    %266 = vector.load %arg2[%c1, %c0_83, %c0_84] : memref<3x4x32xf32, #tpu.memory_space<vmem>>, vector<1x4x32xf32>
    %267 = vector.shape_cast %266 : vector<1x4x32xf32> to vector<4x32xf32>
    %c1_85 = arith.constant 1 : index
    %c0_86 = arith.constant 0 : index
    %c0_87 = arith.constant 0 : index
    %268 = vector.load %arg7[%c1_85, %c0_86, %c0_87] : memref<2x3x128xf32, #tpu.memory_space<vmem>>, vector<1x3x128xf32>
    %269 = vector.shape_cast %268 : vector<1x3x128xf32> to vector<3x128xf32>
    %270 = vector.extract_strided_slice %267 {offsets = [0, 0], sizes = [1, 32], strides = [1, 1]} : vector<4x32xf32> to vector<1x32xf32>
    %271 = vector.shape_cast %270 : vector<1x32xf32> to vector<32xf32>
    %272 = vector.extract_strided_slice %267 {offsets = [1, 0], sizes = [1, 32], strides = [1, 1]} : vector<4x32xf32> to vector<1x32xf32>
    %273 = vector.shape_cast %272 : vector<1x32xf32> to vector<32xf32>
    %cst_88 = arith.constant dense<0.000000e+00> : vector<16xf32>
    %274 = vector.multi_reduction <add>, %265, %cst_88 [1] : vector<16x32xf32> to vector<16xf32>
    %275 = vector.shape_cast %274 : vector<16xf32> to vector<16x1xf32>
    %cst_89 = arith.constant 3.200000e+01 : f32
    %276 = vector.broadcast %cst_89 : f32 to vector<16x1xf32>
    %277 = arith.divf %275, %276 : vector<16x1xf32>
    %278 = vector.broadcast %277 : vector<16x1xf32> to vector<16x32xf32>
    %279 = arith.subf %265, %278 : vector<16x32xf32>
    %280 = arith.mulf %279, %279 : vector<16x32xf32>
    %cst_90 = arith.constant dense<0.000000e+00> : vector<16xf32>
    %281 = vector.multi_reduction <add>, %280, %cst_90 [1] : vector<16x32xf32> to vector<16xf32>
    %282 = vector.shape_cast %281 : vector<16xf32> to vector<16x1xf32>
    %cst_91 = arith.constant 3.200000e+01 : f32
    %283 = vector.broadcast %cst_91 : f32 to vector<16x1xf32>
    %284 = arith.divf %282, %283 : vector<16x1xf32>
    %285 = vector.broadcast %277 : vector<16x1xf32> to vector<16x32xf32>
    %286 = arith.subf %265, %285 : vector<16x32xf32>
    %cst_92 = arith.constant 9.99999974E-6 : f32
    %287 = vector.broadcast %cst_92 : f32 to vector<16x1xf32>
    %288 = arith.addf %284, %287 : vector<16x1xf32>
    %289 = math.rsqrt %288 : vector<16x1xf32>
    %290 = vector.broadcast %289 : vector<16x1xf32> to vector<16x32xf32>
    %291 = arith.mulf %286, %290 : vector<16x32xf32>
    %292 = vector.shape_cast %271 : vector<32xf32> to vector<1x32xf32>
    %293 = vector.broadcast %292 : vector<1x32xf32> to vector<16x32xf32>
    %294 = arith.mulf %291, %293 : vector<16x32xf32>
    %295 = vector.shape_cast %273 : vector<32xf32> to vector<1x32xf32>
    %296 = vector.broadcast %295 : vector<1x32xf32> to vector<16x32xf32>
    %297 = arith.addf %294, %296 : vector<16x32xf32>
    %298 = arith.truncf %297 : vector<16x32xf32> to vector<16x32xbf16>
    %c1_93 = arith.constant 1 : index
    %c0_94 = arith.constant 0 : index
    %c0_95 = arith.constant 0 : index
    %299 = vector.load %arg3[%c1_93, %c0_94, %c0_95] : memref<2x32x96xbf16, #tpu.memory_space<vmem>>, vector<1x32x96xbf16>
    %300 = vector.shape_cast %299 : vector<1x32x96xbf16> to vector<32x96xbf16>
    %cst_96 = arith.constant dense<0.000000e+00> : vector<16x96xf32>
    %301 = tpu.matmul %298, %300, %cst_96 {dimension_numbers = #tpu.dot_dimension_numbers<[1], [0], [0], [1], [0, 0, 1, 1], [], []>} : vector<16x32xbf16>, vector<32x96xbf16>, vector<16x96xf32> -> vector<16x96xf32>
    %302 = arith.truncf %301 : vector<16x96xf32> to vector<16x96xbf16>
    %303 = vector.extract_strided_slice %302 {offsets = [0, 0], sizes = [8, 8], strides = [1, 1]} : vector<16x96xbf16> to vector<8x8xbf16>
    %304 = vector.extract_strided_slice %302 {offsets = [0, 32], sizes = [8, 8], strides = [1, 1]} : vector<16x96xbf16> to vector<8x8xbf16>
    %305 = vector.extract_strided_slice %302 {offsets = [0, 64], sizes = [8, 8], strides = [1, 1]} : vector<16x96xbf16> to vector<8x8xbf16>
    %cst_97 = arith.constant dense<0.000000e+00> : vector<8x8xf32>
    %306 = tpu.matmul %303, %304, %cst_97 {dimension_numbers = #tpu.dot_dimension_numbers<[1], [1], [0], [0], [0, 0, 1, 0], [], []>} : vector<8x8xbf16>, vector<8x8xbf16>, vector<8x8xf32> -> vector<8x8xf32>
    %cst_98 = arith.constant 0.176776692 : f32
    %307 = vector.broadcast %cst_98 : f32 to vector<8x8xf32>
    %308 = arith.mulf %306, %307 : vector<8x8xf32>
    %309 = arith.addf %308, %6 : vector<8x8xf32>
    %cst_99 = arith.constant dense<0xFF800000> : vector<8xf32>
    %310 = vector.multi_reduction <maximumf>, %309, %cst_99 [1] : vector<8x8xf32> to vector<8xf32>
    %cst_100 = arith.constant 0xFF800000 : f32
    %311 = vector.broadcast %cst_100 : f32 to vector<8xf32>
    %312 = arith.maximumf %311, %310 : vector<8xf32>
    %313 = vector.shape_cast %312 : vector<8xf32> to vector<8x1xf32>
    %314 = vector.broadcast %313 : vector<8x1xf32> to vector<8x8xf32>
    %315 = arith.subf %309, %314 : vector<8x8xf32>
    %316 = math.exp %315 : vector<8x8xf32>
    %cst_101 = arith.constant dense<0.000000e+00> : vector<8xf32>
    %317 = vector.multi_reduction <add>, %316, %cst_101 [1] : vector<8x8xf32> to vector<8xf32>
    %318 = vector.shape_cast %317 : vector<8xf32> to vector<8x1xf32>
    %319 = vector.broadcast %318 : vector<8x1xf32> to vector<8x8xf32>
    %320 = arith.divf %316, %319 : vector<8x8xf32>
    %321 = arith.truncf %320 : vector<8x8xf32> to vector<8x8xbf16>
    %cst_102 = arith.constant dense<0.000000e+00> : vector<8x8xf32>
    %322 = tpu.matmul %321, %305, %cst_102 {dimension_numbers = #tpu.dot_dimension_numbers<[1], [0], [0], [1], [0, 0, 1, 1], [], []>} : vector<8x8xbf16>, vector<8x8xbf16>, vector<8x8xf32> -> vector<8x8xf32>
    %323 = vector.extract_strided_slice %302 {offsets = [0, 8], sizes = [8, 8], strides = [1, 1]} : vector<16x96xbf16> to vector<8x8xbf16>
    %324 = vector.extract_strided_slice %302 {offsets = [0, 40], sizes = [8, 8], strides = [1, 1]} : vector<16x96xbf16> to vector<8x8xbf16>
    %325 = vector.extract_strided_slice %302 {offsets = [0, 72], sizes = [8, 8], strides = [1, 1]} : vector<16x96xbf16> to vector<8x8xbf16>
    %cst_103 = arith.constant dense<0.000000e+00> : vector<8x8xf32>
    %326 = tpu.matmul %323, %324, %cst_103 {dimension_numbers = #tpu.dot_dimension_numbers<[1], [1], [0], [0], [0, 0, 1, 0], [], []>} : vector<8x8xbf16>, vector<8x8xbf16>, vector<8x8xf32> -> vector<8x8xf32>
    %cst_104 = arith.constant 0.176776692 : f32
    %327 = vector.broadcast %cst_104 : f32 to vector<8x8xf32>
    %328 = arith.mulf %326, %327 : vector<8x8xf32>
    %329 = arith.addf %328, %6 : vector<8x8xf32>
    %cst_105 = arith.constant dense<0xFF800000> : vector<8xf32>
    %330 = vector.multi_reduction <maximumf>, %329, %cst_105 [1] : vector<8x8xf32> to vector<8xf32>
    %cst_106 = arith.constant 0xFF800000 : f32
    %331 = vector.broadcast %cst_106 : f32 to vector<8xf32>
    %332 = arith.maximumf %331, %330 : vector<8xf32>
    %333 = vector.shape_cast %332 : vector<8xf32> to vector<8x1xf32>
    %334 = vector.broadcast %333 : vector<8x1xf32> to vector<8x8xf32>
    %335 = arith.subf %329, %334 : vector<8x8xf32>
    %336 = math.exp %335 : vector<8x8xf32>
    %cst_107 = arith.constant dense<0.000000e+00> : vector<8xf32>
    %337 = vector.multi_reduction <add>, %336, %cst_107 [1] : vector<8x8xf32> to vector<8xf32>
    %338 = vector.shape_cast %337 : vector<8xf32> to vector<8x1xf32>
    %339 = vector.broadcast %338 : vector<8x1xf32> to vector<8x8xf32>
    %340 = arith.divf %336, %339 : vector<8x8xf32>
    %341 = arith.truncf %340 : vector<8x8xf32> to vector<8x8xbf16>
    %cst_108 = arith.constant dense<0.000000e+00> : vector<8x8xf32>
    %342 = tpu.matmul %341, %325, %cst_108 {dimension_numbers = #tpu.dot_dimension_numbers<[1], [0], [0], [1], [0, 0, 1, 1], [], []>} : vector<8x8xbf16>, vector<8x8xbf16>, vector<8x8xf32> -> vector<8x8xf32>
    %343 = vector.extract_strided_slice %302 {offsets = [0, 16], sizes = [8, 8], strides = [1, 1]} : vector<16x96xbf16> to vector<8x8xbf16>
    %344 = vector.extract_strided_slice %302 {offsets = [0, 48], sizes = [8, 8], strides = [1, 1]} : vector<16x96xbf16> to vector<8x8xbf16>
    %345 = vector.extract_strided_slice %302 {offsets = [0, 80], sizes = [8, 8], strides = [1, 1]} : vector<16x96xbf16> to vector<8x8xbf16>
    %cst_109 = arith.constant dense<0.000000e+00> : vector<8x8xf32>
    %346 = tpu.matmul %343, %344, %cst_109 {dimension_numbers = #tpu.dot_dimension_numbers<[1], [1], [0], [0], [0, 0, 1, 0], [], []>} : vector<8x8xbf16>, vector<8x8xbf16>, vector<8x8xf32> -> vector<8x8xf32>
    %cst_110 = arith.constant 0.176776692 : f32
    %347 = vector.broadcast %cst_110 : f32 to vector<8x8xf32>
    %348 = arith.mulf %346, %347 : vector<8x8xf32>
    %349 = arith.addf %348, %6 : vector<8x8xf32>
    %cst_111 = arith.constant dense<0xFF800000> : vector<8xf32>
    %350 = vector.multi_reduction <maximumf>, %349, %cst_111 [1] : vector<8x8xf32> to vector<8xf32>
    %cst_112 = arith.constant 0xFF800000 : f32
    %351 = vector.broadcast %cst_112 : f32 to vector<8xf32>
    %352 = arith.maximumf %351, %350 : vector<8xf32>
    %353 = vector.shape_cast %352 : vector<8xf32> to vector<8x1xf32>
    %354 = vector.broadcast %353 : vector<8x1xf32> to vector<8x8xf32>
    %355 = arith.subf %349, %354 : vector<8x8xf32>
    %356 = math.exp %355 : vector<8x8xf32>
    %cst_113 = arith.constant dense<0.000000e+00> : vector<8xf32>
    %357 = vector.multi_reduction <add>, %356, %cst_113 [1] : vector<8x8xf32> to vector<8xf32>
    %358 = vector.shape_cast %357 : vector<8xf32> to vector<8x1xf32>
    %359 = vector.broadcast %358 : vector<8x1xf32> to vector<8x8xf32>
    %360 = arith.divf %356, %359 : vector<8x8xf32>
    %361 = arith.truncf %360 : vector<8x8xf32> to vector<8x8xbf16>
    %cst_114 = arith.constant dense<0.000000e+00> : vector<8x8xf32>
    %362 = tpu.matmul %361, %345, %cst_114 {dimension_numbers = #tpu.dot_dimension_numbers<[1], [0], [0], [1], [0, 0, 1, 1], [], []>} : vector<8x8xbf16>, vector<8x8xbf16>, vector<8x8xf32> -> vector<8x8xf32>
    %363 = vector.extract_strided_slice %302 {offsets = [0, 24], sizes = [8, 8], strides = [1, 1]} : vector<16x96xbf16> to vector<8x8xbf16>
    %364 = vector.extract_strided_slice %302 {offsets = [0, 56], sizes = [8, 8], strides = [1, 1]} : vector<16x96xbf16> to vector<8x8xbf16>
    %365 = vector.extract_strided_slice %302 {offsets = [0, 88], sizes = [8, 8], strides = [1, 1]} : vector<16x96xbf16> to vector<8x8xbf16>
    %cst_115 = arith.constant dense<0.000000e+00> : vector<8x8xf32>
    %366 = tpu.matmul %363, %364, %cst_115 {dimension_numbers = #tpu.dot_dimension_numbers<[1], [1], [0], [0], [0, 0, 1, 0], [], []>} : vector<8x8xbf16>, vector<8x8xbf16>, vector<8x8xf32> -> vector<8x8xf32>
    %cst_116 = arith.constant 0.176776692 : f32
    %367 = vector.broadcast %cst_116 : f32 to vector<8x8xf32>
    %368 = arith.mulf %366, %367 : vector<8x8xf32>
    %369 = arith.addf %368, %6 : vector<8x8xf32>
    %cst_117 = arith.constant dense<0xFF800000> : vector<8xf32>
    %370 = vector.multi_reduction <maximumf>, %369, %cst_117 [1] : vector<8x8xf32> to vector<8xf32>
    %cst_118 = arith.constant 0xFF800000 : f32
    %371 = vector.broadcast %cst_118 : f32 to vector<8xf32>
    %372 = arith.maximumf %371, %370 : vector<8xf32>
    %373 = vector.shape_cast %372 : vector<8xf32> to vector<8x1xf32>
    %374 = vector.broadcast %373 : vector<8x1xf32> to vector<8x8xf32>
    %375 = arith.subf %369, %374 : vector<8x8xf32>
    %376 = math.exp %375 : vector<8x8xf32>
    %cst_119 = arith.constant dense<0.000000e+00> : vector<8xf32>
    %377 = vector.multi_reduction <add>, %376, %cst_119 [1] : vector<8x8xf32> to vector<8xf32>
    %378 = vector.shape_cast %377 : vector<8xf32> to vector<8x1xf32>
    %379 = vector.broadcast %378 : vector<8x1xf32> to vector<8x8xf32>
    %380 = arith.divf %376, %379 : vector<8x8xf32>
    %381 = arith.truncf %380 : vector<8x8xf32> to vector<8x8xbf16>
    %cst_120 = arith.constant dense<0.000000e+00> : vector<8x8xf32>
    %382 = tpu.matmul %381, %365, %cst_120 {dimension_numbers = #tpu.dot_dimension_numbers<[1], [0], [0], [1], [0, 0, 1, 1], [], []>} : vector<8x8xbf16>, vector<8x8xbf16>, vector<8x8xf32> -> vector<8x8xf32>
    %383 = tpu.concatenate %322, %342, %362, %382 in 1 : vector<8x8xf32>, vector<8x8xf32>, vector<8x8xf32>, vector<8x8xf32> -> vector<8x32xf32>
    %384 = vector.extract_strided_slice %302 {offsets = [8, 0], sizes = [8, 8], strides = [1, 1]} : vector<16x96xbf16> to vector<8x8xbf16>
    %385 = vector.extract_strided_slice %302 {offsets = [8, 32], sizes = [8, 8], strides = [1, 1]} : vector<16x96xbf16> to vector<8x8xbf16>
    %386 = vector.extract_strided_slice %302 {offsets = [8, 64], sizes = [8, 8], strides = [1, 1]} : vector<16x96xbf16> to vector<8x8xbf16>
    %cst_121 = arith.constant dense<0.000000e+00> : vector<8x8xf32>
    %387 = tpu.matmul %384, %385, %cst_121 {dimension_numbers = #tpu.dot_dimension_numbers<[1], [1], [0], [0], [0, 0, 1, 0], [], []>} : vector<8x8xbf16>, vector<8x8xbf16>, vector<8x8xf32> -> vector<8x8xf32>
    %cst_122 = arith.constant 0.176776692 : f32
    %388 = vector.broadcast %cst_122 : f32 to vector<8x8xf32>
    %389 = arith.mulf %387, %388 : vector<8x8xf32>
    %390 = arith.addf %389, %6 : vector<8x8xf32>
    %cst_123 = arith.constant dense<0xFF800000> : vector<8xf32>
    %391 = vector.multi_reduction <maximumf>, %390, %cst_123 [1] : vector<8x8xf32> to vector<8xf32>
    %cst_124 = arith.constant 0xFF800000 : f32
    %392 = vector.broadcast %cst_124 : f32 to vector<8xf32>
    %393 = arith.maximumf %392, %391 : vector<8xf32>
    %394 = vector.shape_cast %393 : vector<8xf32> to vector<8x1xf32>
    %395 = vector.broadcast %394 : vector<8x1xf32> to vector<8x8xf32>
    %396 = arith.subf %390, %395 : vector<8x8xf32>
    %397 = math.exp %396 : vector<8x8xf32>
    %cst_125 = arith.constant dense<0.000000e+00> : vector<8xf32>
    %398 = vector.multi_reduction <add>, %397, %cst_125 [1] : vector<8x8xf32> to vector<8xf32>
    %399 = vector.shape_cast %398 : vector<8xf32> to vector<8x1xf32>
    %400 = vector.broadcast %399 : vector<8x1xf32> to vector<8x8xf32>
    %401 = arith.divf %397, %400 : vector<8x8xf32>
    %402 = arith.truncf %401 : vector<8x8xf32> to vector<8x8xbf16>
    %cst_126 = arith.constant dense<0.000000e+00> : vector<8x8xf32>
    %403 = tpu.matmul %402, %386, %cst_126 {dimension_numbers = #tpu.dot_dimension_numbers<[1], [0], [0], [1], [0, 0, 1, 1], [], []>} : vector<8x8xbf16>, vector<8x8xbf16>, vector<8x8xf32> -> vector<8x8xf32>
    %404 = vector.extract_strided_slice %302 {offsets = [8, 8], sizes = [8, 8], strides = [1, 1]} : vector<16x96xbf16> to vector<8x8xbf16>
    %405 = vector.extract_strided_slice %302 {offsets = [8, 40], sizes = [8, 8], strides = [1, 1]} : vector<16x96xbf16> to vector<8x8xbf16>
    %406 = vector.extract_strided_slice %302 {offsets = [8, 72], sizes = [8, 8], strides = [1, 1]} : vector<16x96xbf16> to vector<8x8xbf16>
    %cst_127 = arith.constant dense<0.000000e+00> : vector<8x8xf32>
    %407 = tpu.matmul %404, %405, %cst_127 {dimension_numbers = #tpu.dot_dimension_numbers<[1], [1], [0], [0], [0, 0, 1, 0], [], []>} : vector<8x8xbf16>, vector<8x8xbf16>, vector<8x8xf32> -> vector<8x8xf32>
    %cst_128 = arith.constant 0.176776692 : f32
    %408 = vector.broadcast %cst_128 : f32 to vector<8x8xf32>
    %409 = arith.mulf %407, %408 : vector<8x8xf32>
    %410 = arith.addf %409, %6 : vector<8x8xf32>
    %cst_129 = arith.constant dense<0xFF800000> : vector<8xf32>
    %411 = vector.multi_reduction <maximumf>, %410, %cst_129 [1] : vector<8x8xf32> to vector<8xf32>
    %cst_130 = arith.constant 0xFF800000 : f32
    %412 = vector.broadcast %cst_130 : f32 to vector<8xf32>
    %413 = arith.maximumf %412, %411 : vector<8xf32>
    %414 = vector.shape_cast %413 : vector<8xf32> to vector<8x1xf32>
    %415 = vector.broadcast %414 : vector<8x1xf32> to vector<8x8xf32>
    %416 = arith.subf %410, %415 : vector<8x8xf32>
    %417 = math.exp %416 : vector<8x8xf32>
    %cst_131 = arith.constant dense<0.000000e+00> : vector<8xf32>
    %418 = vector.multi_reduction <add>, %417, %cst_131 [1] : vector<8x8xf32> to vector<8xf32>
    %419 = vector.shape_cast %418 : vector<8xf32> to vector<8x1xf32>
    %420 = vector.broadcast %419 : vector<8x1xf32> to vector<8x8xf32>
    %421 = arith.divf %417, %420 : vector<8x8xf32>
    %422 = arith.truncf %421 : vector<8x8xf32> to vector<8x8xbf16>
    %cst_132 = arith.constant dense<0.000000e+00> : vector<8x8xf32>
    %423 = tpu.matmul %422, %406, %cst_132 {dimension_numbers = #tpu.dot_dimension_numbers<[1], [0], [0], [1], [0, 0, 1, 1], [], []>} : vector<8x8xbf16>, vector<8x8xbf16>, vector<8x8xf32> -> vector<8x8xf32>
    %424 = vector.extract_strided_slice %302 {offsets = [8, 16], sizes = [8, 8], strides = [1, 1]} : vector<16x96xbf16> to vector<8x8xbf16>
    %425 = vector.extract_strided_slice %302 {offsets = [8, 48], sizes = [8, 8], strides = [1, 1]} : vector<16x96xbf16> to vector<8x8xbf16>
    %426 = vector.extract_strided_slice %302 {offsets = [8, 80], sizes = [8, 8], strides = [1, 1]} : vector<16x96xbf16> to vector<8x8xbf16>
    %cst_133 = arith.constant dense<0.000000e+00> : vector<8x8xf32>
    %427 = tpu.matmul %424, %425, %cst_133 {dimension_numbers = #tpu.dot_dimension_numbers<[1], [1], [0], [0], [0, 0, 1, 0], [], []>} : vector<8x8xbf16>, vector<8x8xbf16>, vector<8x8xf32> -> vector<8x8xf32>
    %cst_134 = arith.constant 0.176776692 : f32
    %428 = vector.broadcast %cst_134 : f32 to vector<8x8xf32>
    %429 = arith.mulf %427, %428 : vector<8x8xf32>
    %430 = arith.addf %429, %6 : vector<8x8xf32>
    %cst_135 = arith.constant dense<0xFF800000> : vector<8xf32>
    %431 = vector.multi_reduction <maximumf>, %430, %cst_135 [1] : vector<8x8xf32> to vector<8xf32>
    %cst_136 = arith.constant 0xFF800000 : f32
    %432 = vector.broadcast %cst_136 : f32 to vector<8xf32>
    %433 = arith.maximumf %432, %431 : vector<8xf32>
    %434 = vector.shape_cast %433 : vector<8xf32> to vector<8x1xf32>
    %435 = vector.broadcast %434 : vector<8x1xf32> to vector<8x8xf32>
    %436 = arith.subf %430, %435 : vector<8x8xf32>
    %437 = math.exp %436 : vector<8x8xf32>
    %cst_137 = arith.constant dense<0.000000e+00> : vector<8xf32>
    %438 = vector.multi_reduction <add>, %437, %cst_137 [1] : vector<8x8xf32> to vector<8xf32>
    %439 = vector.shape_cast %438 : vector<8xf32> to vector<8x1xf32>
    %440 = vector.broadcast %439 : vector<8x1xf32> to vector<8x8xf32>
    %441 = arith.divf %437, %440 : vector<8x8xf32>
    %442 = arith.truncf %441 : vector<8x8xf32> to vector<8x8xbf16>
    %cst_138 = arith.constant dense<0.000000e+00> : vector<8x8xf32>
    %443 = tpu.matmul %442, %426, %cst_138 {dimension_numbers = #tpu.dot_dimension_numbers<[1], [0], [0], [1], [0, 0, 1, 1], [], []>} : vector<8x8xbf16>, vector<8x8xbf16>, vector<8x8xf32> -> vector<8x8xf32>
    %444 = vector.extract_strided_slice %302 {offsets = [8, 24], sizes = [8, 8], strides = [1, 1]} : vector<16x96xbf16> to vector<8x8xbf16>
    %445 = vector.extract_strided_slice %302 {offsets = [8, 56], sizes = [8, 8], strides = [1, 1]} : vector<16x96xbf16> to vector<8x8xbf16>
    %446 = vector.extract_strided_slice %302 {offsets = [8, 88], sizes = [8, 8], strides = [1, 1]} : vector<16x96xbf16> to vector<8x8xbf16>
    %cst_139 = arith.constant dense<0.000000e+00> : vector<8x8xf32>
    %447 = tpu.matmul %444, %445, %cst_139 {dimension_numbers = #tpu.dot_dimension_numbers<[1], [1], [0], [0], [0, 0, 1, 0], [], []>} : vector<8x8xbf16>, vector<8x8xbf16>, vector<8x8xf32> -> vector<8x8xf32>
    %cst_140 = arith.constant 0.176776692 : f32
    %448 = vector.broadcast %cst_140 : f32 to vector<8x8xf32>
    %449 = arith.mulf %447, %448 : vector<8x8xf32>
    %450 = arith.addf %449, %6 : vector<8x8xf32>
    %cst_141 = arith.constant dense<0xFF800000> : vector<8xf32>
    %451 = vector.multi_reduction <maximumf>, %450, %cst_141 [1] : vector<8x8xf32> to vector<8xf32>
    %cst_142 = arith.constant 0xFF800000 : f32
    %452 = vector.broadcast %cst_142 : f32 to vector<8xf32>
    %453 = arith.maximumf %452, %451 : vector<8xf32>
    %454 = vector.shape_cast %453 : vector<8xf32> to vector<8x1xf32>
    %455 = vector.broadcast %454 : vector<8x1xf32> to vector<8x8xf32>
    %456 = arith.subf %450, %455 : vector<8x8xf32>
    %457 = math.exp %456 : vector<8x8xf32>
    %cst_143 = arith.constant dense<0.000000e+00> : vector<8xf32>
    %458 = vector.multi_reduction <add>, %457, %cst_143 [1] : vector<8x8xf32> to vector<8xf32>
    %459 = vector.shape_cast %458 : vector<8xf32> to vector<8x1xf32>
    %460 = vector.broadcast %459 : vector<8x1xf32> to vector<8x8xf32>
    %461 = arith.divf %457, %460 : vector<8x8xf32>
    %462 = arith.truncf %461 : vector<8x8xf32> to vector<8x8xbf16>
    %cst_144 = arith.constant dense<0.000000e+00> : vector<8x8xf32>
    %463 = tpu.matmul %462, %446, %cst_144 {dimension_numbers = #tpu.dot_dimension_numbers<[1], [0], [0], [1], [0, 0, 1, 1], [], []>} : vector<8x8xbf16>, vector<8x8xbf16>, vector<8x8xf32> -> vector<8x8xf32>
    %464 = tpu.concatenate %403, %423, %443, %463 in 1 : vector<8x8xf32>, vector<8x8xf32>, vector<8x8xf32>, vector<8x8xf32> -> vector<8x32xf32>
    %465 = tpu.concatenate %383, %464 in 0 : vector<8x32xf32>, vector<8x32xf32> -> vector<16x32xf32>
    %466 = arith.truncf %465 : vector<16x32xf32> to vector<16x32xbf16>
    %c1_145 = arith.constant 1 : index
    %c0_146 = arith.constant 0 : index
    %c0_147 = arith.constant 0 : index
    %467 = vector.load %arg4[%c1_145, %c0_146, %c0_147] : memref<2x32x32xbf16, #tpu.memory_space<vmem>>, vector<1x32x32xbf16>
    %468 = vector.shape_cast %467 : vector<1x32x32xbf16> to vector<32x32xbf16>
    %cst_148 = arith.constant dense<0.000000e+00> : vector<16x32xf32>
    %469 = tpu.matmul %466, %468, %cst_148 {dimension_numbers = #tpu.dot_dimension_numbers<[1], [0], [0], [1], [0, 0, 1, 1], [], []>} : vector<16x32xbf16>, vector<32x32xbf16>, vector<16x32xf32> -> vector<16x32xf32>
    %470 = vector.extract_strided_slice %269 {offsets = [0, 0], sizes = [1, 32], strides = [1, 1]} : vector<3x128xf32> to vector<1x32xf32>
    %471 = vector.shape_cast %470 : vector<1x32xf32> to vector<32xf32>
    %472 = vector.shape_cast %471 : vector<32xf32> to vector<1x32xf32>
    %473 = vector.broadcast %472 : vector<1x32xf32> to vector<16x32xf32>
    %474 = arith.addf %469, %473 : vector<16x32xf32>
    %475 = arith.addf %265, %474 : vector<16x32xf32>
    %476 = vector.extract_strided_slice %267 {offsets = [2, 0], sizes = [1, 32], strides = [1, 1]} : vector<4x32xf32> to vector<1x32xf32>
    %477 = vector.shape_cast %476 : vector<1x32xf32> to vector<32xf32>
    %478 = vector.extract_strided_slice %267 {offsets = [3, 0], sizes = [1, 32], strides = [1, 1]} : vector<4x32xf32> to vector<1x32xf32>
    %479 = vector.shape_cast %478 : vector<1x32xf32> to vector<32xf32>
    %cst_149 = arith.constant dense<0.000000e+00> : vector<16xf32>
    %480 = vector.multi_reduction <add>, %475, %cst_149 [1] : vector<16x32xf32> to vector<16xf32>
    %481 = vector.shape_cast %480 : vector<16xf32> to vector<16x1xf32>
    %cst_150 = arith.constant 3.200000e+01 : f32
    %482 = vector.broadcast %cst_150 : f32 to vector<16x1xf32>
    %483 = arith.divf %481, %482 : vector<16x1xf32>
    %484 = vector.broadcast %483 : vector<16x1xf32> to vector<16x32xf32>
    %485 = arith.subf %475, %484 : vector<16x32xf32>
    %486 = arith.mulf %485, %485 : vector<16x32xf32>
    %cst_151 = arith.constant dense<0.000000e+00> : vector<16xf32>
    %487 = vector.multi_reduction <add>, %486, %cst_151 [1] : vector<16x32xf32> to vector<16xf32>
    %488 = vector.shape_cast %487 : vector<16xf32> to vector<16x1xf32>
    %cst_152 = arith.constant 3.200000e+01 : f32
    %489 = vector.broadcast %cst_152 : f32 to vector<16x1xf32>
    %490 = arith.divf %488, %489 : vector<16x1xf32>
    %491 = vector.broadcast %483 : vector<16x1xf32> to vector<16x32xf32>
    %492 = arith.subf %475, %491 : vector<16x32xf32>
    %cst_153 = arith.constant 9.99999974E-6 : f32
    %493 = vector.broadcast %cst_153 : f32 to vector<16x1xf32>
    %494 = arith.addf %490, %493 : vector<16x1xf32>
    %495 = math.rsqrt %494 : vector<16x1xf32>
    %496 = vector.broadcast %495 : vector<16x1xf32> to vector<16x32xf32>
    %497 = arith.mulf %492, %496 : vector<16x32xf32>
    %498 = vector.shape_cast %477 : vector<32xf32> to vector<1x32xf32>
    %499 = vector.broadcast %498 : vector<1x32xf32> to vector<16x32xf32>
    %500 = arith.mulf %497, %499 : vector<16x32xf32>
    %501 = vector.shape_cast %479 : vector<32xf32> to vector<1x32xf32>
    %502 = vector.broadcast %501 : vector<1x32xf32> to vector<16x32xf32>
    %503 = arith.addf %500, %502 : vector<16x32xf32>
    %504 = arith.truncf %503 : vector<16x32xf32> to vector<16x32xbf16>
    %c1_154 = arith.constant 1 : index
    %c0_155 = arith.constant 0 : index
    %c0_156 = arith.constant 0 : index
    %505 = vector.load %arg5[%c1_154, %c0_155, %c0_156] : memref<2x32x128xbf16, #tpu.memory_space<vmem>>, vector<1x32x128xbf16>
    %506 = vector.shape_cast %505 : vector<1x32x128xbf16> to vector<32x128xbf16>
    %cst_157 = arith.constant dense<0.000000e+00> : vector<16x128xf32>
    %507 = tpu.matmul %504, %506, %cst_157 {dimension_numbers = #tpu.dot_dimension_numbers<[1], [0], [0], [1], [0, 0, 1, 1], [], []>} : vector<16x32xbf16>, vector<32x128xbf16>, vector<16x128xf32> -> vector<16x128xf32>
    %508 = vector.extract_strided_slice %269 {offsets = [1, 0], sizes = [1, 128], strides = [1, 1]} : vector<3x128xf32> to vector<1x128xf32>
    %509 = vector.shape_cast %508 : vector<1x128xf32> to vector<128xf32>
    %510 = vector.shape_cast %509 : vector<128xf32> to vector<1x128xf32>
    %511 = vector.broadcast %510 : vector<1x128xf32> to vector<16x128xf32>
    %512 = arith.addf %507, %511 : vector<16x128xf32>
    %cst_158 = arith.constant 0.000000e+00 : f32
    %513 = vector.broadcast %cst_158 : f32 to vector<16x128xf32>
    %514 = arith.maximumf %512, %513 : vector<16x128xf32>
    %515 = arith.truncf %514 : vector<16x128xf32> to vector<16x128xbf16>
    %c1_159 = arith.constant 1 : index
    %c0_160 = arith.constant 0 : index
    %c0_161 = arith.constant 0 : index
    %516 = vector.load %arg6[%c1_159, %c0_160, %c0_161] : memref<2x128x32xbf16, #tpu.memory_space<vmem>>, vector<1x128x32xbf16>
    %517 = vector.shape_cast %516 : vector<1x128x32xbf16> to vector<128x32xbf16>
    %cst_162 = arith.constant dense<0.000000e+00> : vector<16x32xf32>
    %518 = tpu.matmul %515, %517, %cst_162 {dimension_numbers = #tpu.dot_dimension_numbers<[1], [0], [0], [1], [0, 0, 1, 1], [], []>} : vector<16x128xbf16>, vector<128x32xbf16>, vector<16x32xf32> -> vector<16x32xf32>
    %519 = vector.extract_strided_slice %269 {offsets = [2, 0], sizes = [1, 32], strides = [1, 1]} : vector<3x128xf32> to vector<1x32xf32>
    %520 = vector.shape_cast %519 : vector<1x32xf32> to vector<32xf32>
    %521 = vector.shape_cast %520 : vector<32xf32> to vector<1x32xf32>
    %522 = vector.broadcast %521 : vector<1x32xf32> to vector<16x32xf32>
    %523 = arith.addf %518, %522 : vector<16x32xf32>
    %524 = arith.addf %475, %523 : vector<16x32xf32>
    %c2 = arith.constant 2 : index
    %c0_163 = arith.constant 0 : index
    %c0_164 = arith.constant 0 : index
    %525 = vector.load %arg2[%c2, %c0_163, %c0_164] : memref<3x4x32xf32, #tpu.memory_space<vmem>>, vector<1x4x32xf32>
    %526 = vector.shape_cast %525 : vector<1x4x32xf32> to vector<4x32xf32>
    %527 = vector.extract_strided_slice %526 {offsets = [0, 0], sizes = [1, 32], strides = [1, 1]} : vector<4x32xf32> to vector<1x32xf32>
    %528 = vector.shape_cast %527 : vector<1x32xf32> to vector<32xf32>
    %529 = vector.extract_strided_slice %526 {offsets = [1, 0], sizes = [1, 32], strides = [1, 1]} : vector<4x32xf32> to vector<1x32xf32>
    %530 = vector.shape_cast %529 : vector<1x32xf32> to vector<32xf32>
    %cst_165 = arith.constant dense<0.000000e+00> : vector<16xf32>
    %531 = vector.multi_reduction <add>, %524, %cst_165 [1] : vector<16x32xf32> to vector<16xf32>
    %532 = vector.shape_cast %531 : vector<16xf32> to vector<16x1xf32>
    %cst_166 = arith.constant 3.200000e+01 : f32
    %533 = vector.broadcast %cst_166 : f32 to vector<16x1xf32>
    %534 = arith.divf %532, %533 : vector<16x1xf32>
    %535 = vector.broadcast %534 : vector<16x1xf32> to vector<16x32xf32>
    %536 = arith.subf %524, %535 : vector<16x32xf32>
    %537 = arith.mulf %536, %536 : vector<16x32xf32>
    %cst_167 = arith.constant dense<0.000000e+00> : vector<16xf32>
    %538 = vector.multi_reduction <add>, %537, %cst_167 [1] : vector<16x32xf32> to vector<16xf32>
    %539 = vector.shape_cast %538 : vector<16xf32> to vector<16x1xf32>
    %cst_168 = arith.constant 3.200000e+01 : f32
    %540 = vector.broadcast %cst_168 : f32 to vector<16x1xf32>
    %541 = arith.divf %539, %540 : vector<16x1xf32>
    %542 = vector.broadcast %534 : vector<16x1xf32> to vector<16x32xf32>
    %543 = arith.subf %524, %542 : vector<16x32xf32>
    %cst_169 = arith.constant 9.99999974E-6 : f32
    %544 = vector.broadcast %cst_169 : f32 to vector<16x1xf32>
    %545 = arith.addf %541, %544 : vector<16x1xf32>
    %546 = math.rsqrt %545 : vector<16x1xf32>
    %547 = vector.broadcast %546 : vector<16x1xf32> to vector<16x32xf32>
    %548 = arith.mulf %543, %547 : vector<16x32xf32>
    %549 = vector.shape_cast %528 : vector<32xf32> to vector<1x32xf32>
    %550 = vector.broadcast %549 : vector<1x32xf32> to vector<16x32xf32>
    %551 = arith.mulf %548, %550 : vector<16x32xf32>
    %552 = vector.shape_cast %530 : vector<32xf32> to vector<1x32xf32>
    %553 = vector.broadcast %552 : vector<1x32xf32> to vector<16x32xf32>
    %554 = arith.addf %551, %553 : vector<16x32xf32>
    %555 = arith.truncf %554 : vector<16x32xf32> to vector<16x32xbf16>
    %c0_170 = arith.constant 0 : index
    %c0_171 = arith.constant 0 : index
    %556 = vector.load %arg8[%c0_170, %c0_171] : memref<32x128xbf16, #tpu.memory_space<vmem>>, vector<32x128xbf16>
    %cst_172 = arith.constant dense<0.000000e+00> : vector<16x128xf32>
    %557 = tpu.matmul %555, %556, %cst_172 {dimension_numbers = #tpu.dot_dimension_numbers<[1], [0], [0], [1], [0, 0, 1, 1], [], []>} : vector<16x32xbf16>, vector<32x128xbf16>, vector<16x128xf32> -> vector<16x128xf32>
    %c0_173 = arith.constant 0 : index
    %c0_174 = arith.constant 0 : index
    %558 = vector.load %arg9[%c0_173, %c0_174] : memref<1x128xf32, #tpu.memory_space<vmem>>, vector<1x128xf32>
    %559 = vector.shape_cast %558 : vector<1x128xf32> to vector<128xf32>
    %560 = vector.shape_cast %559 : vector<128xf32> to vector<1x128xf32>
    %561 = vector.broadcast %560 : vector<1x128xf32> to vector<16x128xf32>
    %562 = arith.addf %557, %561 : vector<16x128xf32>
    %c0_175 = arith.constant 0 : index
    %c0_176 = arith.constant 0 : index
    %563 = vector.load %arg10[%c0_175, %c0_176] : memref<16x128xf32, #tpu.memory_space<vmem>>, vector<16x128xf32>
    tpu.vector_store %arg10[%c0_175, %c0_176], %562 {strides = array<i32>} : memref<16x128xf32, #tpu.memory_space<vmem>>, vector<16x128xf32>,
    return
  }
  func.func @transform_0(%arg0: i32) -> (i32, i32) {
    %c0_i32 = arith.constant 0 : i32
    %c0_i32_0 = arith.constant 0 : i32
    %c0_i32_1 = arith.constant 0 : i32
    return %c0_i32, %c0_i32_0 : i32, i32
  }
  func.func @transform_1(%arg0: i32) -> (i32, i32, i32) {
    %c0_i32 = arith.constant 0 : i32
    %c0_i32_0 = arith.constant 0 : i32
    %c0_i32_1 = arith.constant 0 : i32
    %c0_i32_2 = arith.constant 0 : i32
    return %c0_i32, %c0_i32_0, %c0_i32_1 : i32, i32, i32
  }
  func.func @transform_2(%arg0: i32) -> (i32, i32, i32) {
    %c0_i32 = arith.constant 0 : i32
    %c0_i32_0 = arith.constant 0 : i32
    %c0_i32_1 = arith.constant 0 : i32
    %c0_i32_2 = arith.constant 0 : i32
    return %c0_i32, %c0_i32_0, %c0_i32_1 : i32, i32, i32
  }
  func.func @transform_3(%arg0: i32) -> (i32, i32, i32) {
    %c0_i32 = arith.constant 0 : i32
    %c0_i32_0 = arith.constant 0 : i32
    %c0_i32_1 = arith.constant 0 : i32
    %c0_i32_2 = arith.constant 0 : i32
    return %c0_i32, %c0_i32_0, %c0_i32_1 : i32, i32, i32
  }
  func.func @transform_4(%arg0: i32) -> (i32, i32, i32) {
    %c0_i32 = arith.constant 0 : i32
    %c0_i32_0 = arith.constant 0 : i32
    %c0_i32_1 = arith.constant 0 : i32
    %c0_i32_2 = arith.constant 0 : i32
    return %c0_i32, %c0_i32_0, %c0_i32_1 : i32, i32, i32
  }
  func.func @transform_5(%arg0: i32) -> (i32, i32, i32) {
    %c0_i32 = arith.constant 0 : i32
    %c0_i32_0 = arith.constant 0 : i32
    %c0_i32_1 = arith.constant 0 : i32
    %c0_i32_2 = arith.constant 0 : i32
    return %c0_i32, %c0_i32_0, %c0_i32_1 : i32, i32, i32
  }
  func.func @transform_6(%arg0: i32) -> (i32, i32, i32) {
    %c0_i32 = arith.constant 0 : i32
    %c0_i32_0 = arith.constant 0 : i32
    %c0_i32_1 = arith.constant 0 : i32
    %c0_i32_2 = arith.constant 0 : i32
    return %c0_i32, %c0_i32_0, %c0_i32_1 : i32, i32, i32
  }
  func.func @transform_7(%arg0: i32) -> (i32, i32) {
    %c0_i32 = arith.constant 0 : i32
    %c0_i32_0 = arith.constant 0 : i32
    %c0_i32_1 = arith.constant 0 : i32
    return %c0_i32, %c0_i32_0 : i32, i32
  }
  func.func @transform_8(%arg0: i32) -> (i32, i32) {
    %c0_i32 = arith.constant 0 : i32
    %c0_i32_0 = arith.constant 0 : i32
    %c0_i32_1 = arith.constant 0 : i32
    return %c0_i32, %c0_i32_0 : i32, i32
  }
  func.func @transform_9(%arg0: i32) -> (i32, i32) {
    %c0_i32 = arith.constant 0 : i32
    %c0_i32_0 = arith.constant 0 : i32
    %c0_i32_1 = arith.constant 0 : i32
    return %c0_i32, %c0_i32_0 : i32, i32
  }
}

</mosaic_0001>

<bundles_post_ra>
// kernel: tpu_custom_call.1
= control target key start
LH: loop header
LB: loop body
LE: loop exit
PB: predicated region body
PF: predicated region fallthrough
CT: control target
= control target key end

     0   :  { %vm44_vm0 = vcmask 261120   ;;  %s4233_s0 = inlined_call_operand.vmem [shape: f32[16,32], index: 0, kind: input, shape index: {}]   ;;  %s4234_s1 = inlined_call_operand.vmem [shape: f32[3,4,32], index: 1, kind: input, shape index: {}]   ;;  %s4235_s2 = inlined_call_operand.vmem [shape: bf16[2,32,96], index: 2, kind: input, shape index: {}]   ;;  %s4236_s3 = inlined_call_operand.vmem [shape: bf16[2,32,32], index: 3, kind: input, shape index: {}]   ;;  %s4237_s4 = inlined_call_operand.vmem [shape: bf16[2,32,128], index: 4, kind: input, shape index: {}]   ;;  %s4238_s5 = inlined_call_operand.vmem [shape: bf16[2,128,32], index: 5, kind: input, shape index: {}]   ;;  %s4239_s6 = inlined_call_operand.vmem [shape: f32[2,3,128], index: 6, kind: input, shape index: {}]   ;;  %s4240_s7 = inlined_call_operand.vmem [shape: bf16[32,128], index: 7, kind: input, shape index: {}]   ;;  %s4241_s8 = inlined_call_operand.vmem [shape: f32[1,128], index: 8, kind: input, shape index: {}]   ;;  %s4242_s9 = inlined_call_operand.hbm [shape: f32[16,128], index: 9, kind: output, shape index: {}]  }
   0x1   :  { %v3551_v0 = vld [vmem:[%s4233_s0] sm:$0xff]  ;;  %v3556_v1 = vld [vmem:[%s4233_s0 + $0x8] sm:$0xff] }
   0x2   :  { %v45_v2 = vsel %vm44_vm0, %v3551_v0, 0.0  ;;  %v48_v3 = vsel %vm44_vm0, %v3556_v1, 0.0 }
   0x3   :  { %46 = vadd.xlane.f32.xlu0 %v45_v2 }
   0x7   :  { %49 = vadd.xlane.f32.xlu0 %v48_v3 }
   0x8   :  { %14 = vsyncpa [#allocation3], 0  ;;  %v3341_v14 = vld [vmem:[%s4235_s2] sm:$0xff]   ;;  %v3479_v15 = vmov 0.0   ;;  %vm3480_vm1 = vmmov 0   ;;  %v3342_v16 = vld [vmem:[%s4235_s2 + $0x8] sm:$0xff]   ;;  %v36_v21 = vlaneseq }
   0x9   :  { %3004 = vmatprep.subr.bf16.mxu1 %v3479_v15  ;;  %3008 = vmatprep.mubr.msk.bf16.mxu1 %vm3480_vm1, %v3479_v15  ;;  %v3589_v26 = vld [vmem:[%s4234_s1] sm:$0xf]  ;;  %s3481_s18 = smov 88   ;;  %s3482_s19 = smov 96   ;;  %vm149_vm2 = vcmask 64512   ;;  %vm215_vm4 = vcmask 1043456  }
   0xa   :  { %3005 = vmatpush3.bf16.msra.mxu1 %v3341_v14  ;;  %3018 = vmatprep.subr.bf16.mxu0 %v3479_v15  ;;  %v3581_v24 = vshrl.u32 %v36_v21, 7  ;;  %s3483_s20 = smov 120   ;;  %s3484_s21 = smov 112   ;;  %vm608_vm5 = vcmask 130048   ;;  %vm610_vm6 = vcmask 195584  }
   0xb   :  { %3006 = vmatprep.subr.bf16.mxu1 %v3479_v15  ;;  %3020 = vmatprep.mubr.msk.bf16.mxu0 %vm3480_vm1, %v3479_v15  ;;  %s3485_s22 = smov 80   ;;  %s3486_s23 = smov 104  }
   0xc   :  { %v3584_v25 = vsub.s32 0, %v3581_v24  ;;  %v3594_v30 = vsub.s32 1, %v3581_v24  ;;  %s3487_s24 = smov 72   ;;  %s3488_s25 = smov 56  }
   0xd   :  { %s3490_s26 = smov 64   ;;  %s3491_s27 = smov 48  }
   0xe   :  { %3007 = vmatpush3.bf16.msra.mxu1 %v3342_v16  ;;  %v75_v29 = vrot.slane %v3589_v26, %v3584_v25  ;;  %v81_v34 = vrot.slane %v3589_v26, %v3594_v30  ;;  %s3492_s28 = smov 40   ;;  %s3493_s29 = smov 8  }
   0xf   :  { %3012 = vmatprep.subr.bf16.mxu1 %v3479_v15  ;;  %s3494_s11 = smov 16   ;;  %s3495_s13 = smov 24  }
  0x90   :  { %v47_v4 = vpop.xlane.xlu0 %46 }
  0x91   :  { %v52_v5 = vmul.f32 0.03125, %v47_v4 }
  0x93   :  { %v54_v6 = vsub.f32 %v3551_v0, %v52_v5  ;;  %v39_v5 = vand.u32 127, %v36_v21 }
  0x94   :  { %v50_v7 = vpop.xlane.xlu0 %49 }
  0x95   :  { %v53_v8 = vmul.f32 0.03125, %v50_v7  ;;  %v56_v9 = vmul.f32 %v54_v6, %v54_v6  ;;  %vm40_vm3 = vcmp.ge.s32.totalorder %v3581_v24, %v39_v5 }
  0x97   :  { %v55_v10 = vsub.f32 %v3556_v1, %v53_v8  ;;  %v58_v11 = vsel %vm44_vm0, %v56_v9, 0.0 }
  0x98   :  { %59 = vadd.xlane.f32.xlu1 %v58_v11 }
  0x99   :  { %v57_v12 = vmul.f32 %v55_v10, %v55_v10 }
  0x9b   :  { %v61_v13 = vsel %vm44_vm0, %v57_v12, 0.0 }
  0x9c   :  { %62 = vadd.xlane.f32.xlu1 %v61_v13 }
 0x125   :  { %v60_v17 = vpop.xlane.xlu1 %59 }
 0x126   :  { %v64_v18 = vmul.f32 0.03125, %v60_v17 }
 0x128   :  { %v66_v19 = vadd.f32 1e-05, %v64_v18 }
 0x129   :  { %v63_v20 = vpop.xlane.xlu1 %62 }
 0x12a   :  { %3371 = vrsqrt.f32 %v66_v19  ;;  %v65_v22 = vmul.f32 0.03125, %v63_v20 }
 0x12c   :  { %v67_v23 = vadd.f32 1e-05, %v65_v22 }
 0x12e   :  { %3373 = vrsqrt.f32 %v67_v23 }
 0x134   :  { %v3372_v27 = vpop.eup %3371 }
 0x135   :  { %v70_v28 = vmul.f32 %v3372_v27, %v54_v6  ;;  %v3489_v6 = vmov -1e+30  }
 0x136   :  { %v3680_v7 = vsel %vm40_vm3, 0.0, %v3489_v6 }
 0x137   :  { %v76_v33 = vmul.f32 %v75_v29, %v70_v28 }
 0x138   :  { %v3374_v31 = vpop.eup %3373 }
 0x139   :  { %v71_v32 = vmul.f32 %v3374_v31, %v55_v10  ;;  %v82_v36 = vadd.f32 %v81_v34, %v76_v33 }
 0x13b   :  { %v77_v35 = vmul.f32 %v75_v29, %v71_v32 }
 0x13d   :  { %v83_v37 = vadd.f32 %v81_v34, %v77_v35 }
 0x13f   :  { %v84_v38 = vpack.c.bf16 %v83_v37, %v82_v36 }
 0x141   :  { %3009 = vmatmul.mubr.msk.bf16.vlgmr.msra.gmra.mrb[0].mxu1 %vm44_vm0, %v84_v38 }
 0x142   :  { %3014 = vmatprep.mubr.msk.bf16.mxu1 %vm3480_vm1, %v3479_v15 }
 0x214   :  { %v138_v39 = vpop.f32.mrb[0].mxu1 }
 0x215   :  { %v3010_v40 = vpop.f32.mrb[1].mxu1 }
 0x216   :  { %v141_v41 = vpop.f32.mrb[2].mxu1 }
 0x217   :  { %v3601_v42 = vpack.c.bf16 %v141_v41, %v138_v39  ;;  %v3011_v43 = vpop.f32.mrb[3].mxu1 }
 0x219   :  { %261 = vrot.lane.b32.xlu1 %v3601_v42, %s3481_s18  ;;  %147 = vrot.lane.b32.xlu0 %v3601_v42, %s3482_s19  ;;  %v3616_v44 = vrot.slane %v3601_v42, 4 }
 0x21d   :  { %259 = vrot.lane.b32.xlu1 %v3601_v42, %s3483_s20  ;;  %371 = vrot.lane.b32.xlu0 %v3601_v42, %s3484_s21 }
 0x221   :  { %373 = vrot.lane.b32.xlu1 %v3601_v42, %s3485_s22  ;;  %483 = vrot.lane.b32.xlu0 %v3601_v42, %s3486_s23 }
 0x225   :  { %485 = vrot.lane.b32.xlu1 %v3601_v42, %s3487_s24  ;;  %725 = vrot.lane.b32.xlu0 %v3616_v44, %s3481_s18 }
 0x229   :  { %837 = vrot.lane.b32.xlu0 %v3616_v44, %s3485_s22  ;;  %613 = vrot.lane.b32.xlu1 %v3616_v44, %s3482_s19 }
 0x22d   :  { %949 = vrot.lane.b32.xlu0 %v3616_v44, %s3487_s24  ;;  %723 = vrot.lane.b32.xlu1 %v3616_v44, %s3483_s20 }
 0x231   :  { %835 = vrot.lane.b32.xlu1 %v3616_v44, %s3484_s21 }
 0x235   :  { %947 = vrot.lane.b32.xlu1 %v3616_v44, %s3486_s23 }
 0x239   :  { %323 = vrot.lane.b32.xlu1 %v3601_v42, %s3488_s25 }
 0x28b   :  { %v148_v45 = vpop.permute.xlu0 %147  ;;  %v262_v47 = vpop.permute.xlu1 %261 }
 0x28c   :  { %v154_v46 = vsel %vm149_vm2, %v148_v45, 0  ;;  %v267_v49 = vsel %vm149_vm2, %v262_v47, 0 }
 0x28d   :  { %3013 = vmatpush3.bf16.xpose.msra.mxu1 %v154_v46 }
 0x28e   :  { %3024 = vmatprep.subr.bf16.mxu1 %v3479_v15 }
 0x28f   :  { %v260_v48 = vpop.permute.xlu1 %259  ;;  %v372_v53 = vpop.permute.xlu0 %371 }
 0x293   :  { %v374_v50 = vpop.permute.xlu1 %373  ;;  %v484_v56 = vpop.permute.xlu0 %483 }
 0x294   :  { %3015 = vmatmul.mubr.msk.bf16.vlgmr.msra.gmra.mrb[4].mxu1 %vm149_vm2, %v3601_v42  ;;  %v379_v51 = vsel %vm149_vm2, %v374_v50, 0 }
 0x295   :  { %3025 = vmatpush3.bf16.xpose.msra.mxu1 %v267_v49  ;;  %3026 = vmatprep.mubr.msk.bf16.mxu1 %vm3480_vm1, %v3479_v15 }
 0x296   :  { %3036 = vmatprep.subr.bf16.mxu1 %v3479_v15 }
 0x297   :  { %v486_v52 = vpop.permute.xlu1 %485  ;;  %v726_v58 = vpop.permute.xlu0 %725 }
 0x298   :  { %v491_v54 = vsel %vm149_vm2, %v486_v52, 0  ;;  %v731_v59 = vsel %vm149_vm2, %v726_v58, 0 }
 0x29b   :  { %v614_v55 = vpop.permute.xlu1 %613  ;;  %v838_v60 = vpop.permute.xlu0 %837 }
 0x29c   :  { %3027 = vmatmul.mubr.msk.bf16.vlgmr.msra.gmra.mrb[8].mxu1 %vm149_vm2, %v260_v48  ;;  %v619_v57 = vsel %vm149_vm2, %v614_v55, 0  ;;  %v843_v62 = vsel %vm149_vm2, %v838_v60, 0 }
 0x29d   :  { %3037 = vmatpush3.bf16.xpose.msra.mxu1 %v379_v51  ;;  %3038 = vmatprep.mubr.msk.bf16.mxu1 %vm3480_vm1, %v3479_v15 }
 0x29e   :  { %3048 = vmatprep.subr.bf16.mxu1 %v3479_v15 }
 0x29f   :  { %v724_v61 = vpop.permute.xlu1 %723  ;;  %v950_v63 = vpop.permute.xlu0 %949 }
 0x2a0   :  { %v955_v3 = vsel %vm149_vm2, %v950_v63, 0 }
 0x2a3   :  { %v836_v2 = vpop.permute.xlu1 %835 }
 0x2a4   :  { %3039 = vmatmul.mubr.msk.bf16.vlgmr.msra.gmra.mrb[12].mxu1 %vm149_vm2, %v372_v53 }
 0x2a5   :  { %3049 = vmatpush3.bf16.xpose.msra.mxu1 %v491_v54  ;;  %3050 = vmatprep.mubr.msk.bf16.mxu1 %vm3480_vm1, %v3479_v15 }
 0x2a6   :  { %3060 = vmatprep.subr.bf16.mxu1 %v3479_v15 }
 0x2a7   :  { %v948_v4 = vpop.permute.xlu1 %947 }
 0x2ac   :  { %3051 = vmatmul.mubr.msk.bf16.vlgmr.msra.gmra.mrb[16].mxu1 %vm149_vm2, %v484_v56 }
 0x2ad   :  { %3061 = vmatpush3.bf16.xpose.msra.mxu1 %v619_v57  ;;  %3062 = vmatprep.mubr.msk.bf16.mxu1 %vm3480_vm1, %v3479_v15 }
 0x2ae   :  { %3072 = vmatprep.subr.bf16.mxu1 %v3479_v15 }
 0x2b4   :  { %3063 = vmatmul.mubr.msk.bf16.vlgmr.msra.gmra.mrb[20].mxu1 %vm149_vm2, %v3616_v44 }
 0x2b5   :  { %3073 = vmatpush3.bf16.xpose.msra.mxu1 %v731_v59  ;;  %3074 = vmatprep.mubr.msk.bf16.mxu1 %vm3480_vm1, %v3479_v15 }
 0x2b6   :  { %3084 = vmatprep.subr.bf16.mxu1 %v3479_v15 }
 0x2bc   :  { %3075 = vmatmul.mubr.msk.bf16.vlgmr.msra.gmra.mrb[24].mxu1 %vm149_vm2, %v724_v61 }
 0x2bd   :  { %3085 = vmatpush3.bf16.xpose.msra.mxu1 %v843_v62  ;;  %3086 = vmatprep.mubr.msk.bf16.mxu1 %vm3480_vm1, %v3479_v15 }
 0x2be   :  { %3096 = vmatprep.subr.bf16.mxu1 %v3479_v15 }
 0x2c4   :  { %3087 = vmatmul.mubr.msk.bf16.vlgmr.msra.gmra.mrb[28].mxu1 %vm149_vm2, %v836_v2 }
 0x2c5   :  { %3097 = vmatpush3.bf16.xpose.msra.mxu1 %v955_v3  ;;  %3098 = vmatprep.mubr.msk.bf16.mxu1 %vm3480_vm1, %v3479_v15 }
 0x2c6   :  { %3108 = vmatprep.subr.bf16.mxu1 %v3479_v15 }
 0x2cc   :  { %3099 = vmatmul.mubr.msk.bf16.vlgmr.msra.gmra.mrb[32].mxu1 %vm149_vm2, %v948_v4 }
 0x2cd   :  { %3112 = vmatprep.mubr.msk.bf16.mxu1 %vm3480_vm1, %v3479_v15 }
 0x367   :  { %v190_v8 = vpop.f32.mrb[4].mxu1 }
 0x368   :  { %v196_v9 = vmul.f32 0.17677669, %v190_v8  ;;  %v3016_v10 = vpop.f32.mrb[5].mxu1 }
 0x369   :  { %v193_v11 = vpop.f32.mrb[6].mxu1 }
 0x36a   :  { %v3017_v12 = vpop.f32.mrb[7].mxu1  ;;  %v3683_v13 = vadd.f32 %v196_v9, %v3680_v7 }
 0x36c   :  { %v198_v14 = vsel %vm149_vm2, %v3683_v13, -inf }
 0x36d   :  { %199 = vmax.xlane.f32.xlu0 %v198_v14  ;;  %v3715_v14 = vpop.permute.xlu1 %323 }
 0x36f   :  { %v303_v16 = vpop.f32.mrb[8].mxu1 }
 0x370   :  { %v309_v17 = vmul.f32 0.17677669, %v303_v16  ;;  %v3028_v18 = vpop.f32.mrb[9].mxu1 }
 0x371   :  { %v306_v19 = vpop.f32.mrb[10].mxu1 }
 0x372   :  { %v3029_v20 = vpop.f32.mrb[11].mxu1  ;;  %v3688_v21 = vadd.f32 %v309_v17, %v3680_v7 }
 0x374   :  { %v311_v22 = vsel %vm149_vm2, %v3688_v21, -inf }
 0x375   :  { %312 = vmax.xlane.f32.xlu1 %v311_v22 }
 0x377   :  { %v415_v23 = vpop.f32.mrb[12].mxu1 }
 0x378   :  { %v3040_v27 = vpop.f32.mrb[13].mxu1  ;;  %v421_v50 = vmul.f32 0.17677669, %v415_v23 }
 0x379   :  { %v418_v28 = vpop.f32.mrb[14].mxu1 }
 0x37a   :  { %v3041_v29 = vpop.f32.mrb[15].mxu1  ;;  %v422_v54 = vadd.f32 %v421_v50, %v3680_v7 }
 0x37c   :  { %v423_v60 = vsel %vm149_vm2, %v422_v54, -inf }
 0x37f   :  { %v527_v31 = vpop.f32.mrb[16].mxu1 }
 0x380   :  { %v3052_v32 = vpop.f32.mrb[17].mxu1  ;;  %v533_v53 = vmul.f32 0.17677669, %v527_v31 }
 0x381   :  { %v530_v33 = vpop.f32.mrb[18].mxu1 }
 0x382   :  { %v3053_v34 = vpop.f32.mrb[19].mxu1  ;;  %v534_v61 = vadd.f32 %v533_v53, %v3680_v7 }
 0x383   :  { %210 = vrot.lane.b32.xlu0 %v3601_v42, %s3490_s26 }
 0x384   :  { %v535_v4 = vsel %vm149_vm2, %v534_v61, -inf }
 0x387   :  { %v655_v35 = vpop.f32.mrb[20].mxu1 }
 0x388   :  { %v3064_v36 = vpop.f32.mrb[21].mxu1  ;;  %v661_v58 = vmul.f32 0.17677669, %v655_v35 }
 0x389   :  { %v658_v37 = vpop.f32.mrb[22].mxu1 }
 0x38a   :  { %v3065_v38 = vpop.f32.mrb[23].mxu1  ;;  %v662_v5 = vadd.f32 %v661_v58, %v3680_v7 }
 0x38c   :  { %v663_v6 = vsel %vm149_vm2, %v662_v5, -inf }
 0x38f   :  { %v767_v39 = vpop.f32.mrb[24].mxu1 }
 0x390   :  { %v773_v40 = vmul.f32 0.17677669, %v767_v39  ;;  %v3076_v41 = vpop.f32.mrb[25].mxu1 }
 0x391   :  { %v770_v43 = vpop.f32.mrb[26].mxu1 }
 0x392   :  { %v3077_v45 = vpop.f32.mrb[27].mxu1  ;;  %v3695_v46 = vadd.f32 %v773_v40, %v3680_v7 }
 0x394   :  { %v775_v47 = vsel %vm149_vm2, %v3695_v46, -inf }
 0x395   :  { %776 = vmax.xlane.f32.xlu1 %v775_v47 }
 0x397   :  { %v879_v48 = vpop.f32.mrb[28].mxu1 }
 0x398   :  { %v3088_v49 = vpop.f32.mrb[29].mxu1  ;;  %v885_v3 = vmul.f32 0.17677669, %v879_v48 }
 0x399   :  { %v882_v51 = vpop.f32.mrb[30].mxu1 }
 0x39a   :  { %v3089_v52 = vpop.f32.mrb[31].mxu1  ;;  %v886_v8 = vadd.f32 %v885_v3, %v3680_v7  ;;  %v329_v3 = vsel %vm215_vm4, %v3715_v14, 0 }
 0x39c   :  { %v887_v9 = vsel %vm149_vm2, %v886_v8, -inf }
 0x39f   :  { %v991_v55 = vpop.f32.mrb[32].mxu1 }
 0x3a0   :  { %v997_v56 = vmul.f32 0.17677669, %v991_v55  ;;  %v3100_v57 = vpop.f32.mrb[33].mxu1 }
 0x3a1   :  { %v994_v59 = vpop.f32.mrb[34].mxu1 }
 0x3a2   :  { %424 = vmax.xlane.f32.xlu0 %v423_v60  ;;  %v3101_v62 = vpop.f32.mrb[35].mxu1  ;;  %v3703_v63 = vadd.f32 %v997_v56, %v3680_v7 }
 0x3a4   :  { %v999_v2 = vsel %vm149_vm2, %v3703_v63, -inf }
 0x3a5   :  { %1000 = vmax.xlane.f32.xlu1 %v999_v2 }
 0x3a6   :  { %536 = vmax.xlane.f32.xlu0 %v535_v4 }
 0x3aa   :  { %664 = vmax.xlane.f32.xlu0 %v663_v6 }
 0x3ae   :  { %888 = vmax.xlane.f32.xlu0 %v887_v9 }
 0x3c4   :  { %435 = vrot.lane.b32.xlu0 %v3601_v42, %s3491_s27 }
 0x3fa   :  { %v200_v10 = vpop.xlane.xlu0 %199 }
 0x3fb   :  { %v201_v11 = vsub.f32 %v3683_v13, %v200_v10 }
 0x3fd   :  { %v202_v12 = vmul.f32 1.442695, %v201_v11 }
 0x3fe   :  { %v211_v16 = vpop.permute.xlu0 %210 }
 0x3ff   :  { %3375 = vpow2.f32 %v202_v12  ;;  %v217_v17 = vsel %vm215_vm4, %v211_v16, 0 }
 0x400   :  { %3019 = vmatpush3.bf16.msra.mxu0 %v217_v17 }
 0x401   :  { %3030 = vmatprep.subr.bf16.mxu0 %v3479_v15 }
 0x402   :  { %v313_v18 = vpop.xlane.xlu1 %312 }
 0x403   :  { %v314_v19 = vsub.f32 %v3688_v21, %v313_v18 }
 0x405   :  { %v315_v20 = vmul.f32 1.442695, %v314_v19 }
 0x407   :  { %3377 = vpow2.f32 %v315_v20 }
 0x409   :  { %v3376_v22 = vpop.eup %3375 }
 0x40a   :  { %v204_v23 = vsel %vm149_vm2, %v3376_v22, 0.0 }
 0x40b   :  { %205 = vadd.xlane.f32.xlu0 %v204_v23 }
 0x411   :  { %v3721_v13 = vpop.eup %3377 }
 0x412   :  { %v317_v27 = vsel %vm149_vm2, %v3721_v13, 0.0 }
 0x413   :  { %318 = vadd.xlane.f32.xlu1 %v317_v27 }
 0x422   :  { %v777_v34 = vpop.xlane.xlu1 %776 }
 0x423   :  { %v778_v37 = vsub.f32 %v3695_v46, %v777_v34 }
 0x424   :  { %675 = vrot.lane.b32.xlu1 %v3616_v44, %s3490_s26 }
 0x425   :  { %v779_v40 = vmul.f32 1.442695, %v778_v37 }
 0x42f   :  { %v425_v28 = vpop.xlane.xlu0 %424 }
 0x430   :  { %v426_v29 = vsub.f32 %v422_v54, %v425_v28 }
 0x432   :  { %v427_v31 = vmul.f32 1.442695, %v426_v29  ;;  %v1001_v53 = vpop.xlane.xlu1 %1000 }
 0x433   :  { %v537_v32 = vpop.xlane.xlu0 %536  ;;  %v1002_v54 = vsub.f32 %v3703_v63, %v1001_v53 }
 0x434   :  { %3379 = vpow2.f32 %v427_v31  ;;  %v538_v21 = vsub.f32 %v534_v61, %v537_v32 }
 0x435   :  { %v1003_v56 = vmul.f32 1.442695, %v1002_v54 }
 0x436   :  { %v539_v33 = vmul.f32 1.442695, %v538_v21 }
 0x437   :  { %v665_v35 = vpop.xlane.xlu0 %664 }
 0x438   :  { %v666_v36 = vsub.f32 %v662_v5, %v665_v35  ;;  %3381 = vpow2.f32 %v539_v33 }
 0x43a   :  { %v667_v38 = vmul.f32 1.442695, %v666_v36 }
 0x43b   :  { %v889_v50 = vpop.xlane.xlu0 %888 }
 0x43c   :  { %3383 = vpow2.f32 %v667_v38  ;;  %v890_v51 = vsub.f32 %v886_v8, %v889_v50 }
 0x43d   :  { %3385 = vpow2.f32 %v779_v40 }
 0x43e   :  { %v3380_v39 = vpop.eup %3379  ;;  %v891_v52 = vmul.f32 1.442695, %v890_v51 }
 0x43f   :  { %v429_v41 = vsel %vm149_vm2, %v3380_v39, 0.0  ;;  %v436_v59 = vpop.permute.xlu0 %435 }
 0x440   :  { %430 = vadd.xlane.f32.xlu0 %v429_v41  ;;  %3387 = vpow2.f32 %v891_v52  ;;  %v441_v6 = vsel %vm215_vm4, %v436_v59, 0 }
 0x441   :  { %3389 = vpow2.f32 %v1003_v56 }
 0x442   :  { %v3729_v43 = vpop.eup %3381 }
 0x443   :  { %v541_v45 = vsel %vm149_vm2, %v3729_v43, 0.0 }
 0x446   :  { %v3733_v47 = vpop.eup %3383 }
 0x447   :  { %v669_v46 = vsel %vm149_vm2, %v3733_v47, 0.0  ;;  %v3737_v48 = vpop.eup %3385 }
 0x448   :  { %542 = vadd.xlane.f32.xlu1 %v541_v45  ;;  %v781_v49 = vsel %vm149_vm2, %v3737_v48, 0.0 }
 0x44a   :  { %v3746_v55 = vpop.eup %3387 }
 0x44b   :  { %v893_v57 = vsel %vm149_vm2, %v3746_v55, 0.0  ;;  %v3750_v58 = vpop.eup %3389 }
 0x44c   :  { %670 = vadd.xlane.f32.xlu1 %v669_v46 }
 0x450   :  { %782 = vadd.xlane.f32.xlu1 %v781_v49 }
 0x456   :  { %547 = vrot.lane.b32.xlu0 %v3601_v42, %s3492_s28  ;;  %v1005_v42 = vsel %vm149_vm2, %v3750_v58, 0.0 }
 0x461   :  { %787 = vrot.lane.b32.xlu1 %v3616_v44, %s3488_s25 }
 0x475   :  { %894 = vadd.xlane.f32.xlu0 %v893_v57 }
 0x485   :  { %1006 = vadd.xlane.f32.xlu1 %v1005_v42 }
 0x48b   :  { %899 = vrot.lane.b32.xlu0 %v3616_v44, %s3491_s27 }
 0x496   :  { %1011 = vrot.lane.b32.xlu1 %v3616_v44, %s3492_s28 }
 0x498   :  { %v206_v60 = vpop.xlane.xlu0 %205 }
 0x499   :  { %3391 = vrcp.f32 %v206_v60 }
 0x4a0   :  { %v319_v61 = vpop.xlane.xlu1 %318 }
 0x4a1   :  { %3393 = vrcp.f32 %v319_v61 }
 0x4a3   :  { %v3392_v62 = vpop.eup %3391 }
 0x4a4   :  { %v208_v63 = vmul.f32 %v3392_v62, %v3376_v22  ;;  %v676_v9 = vpop.permute.xlu1 %675 }
 0x4a5   :  { %v681_v27 = vsel %vm215_vm4, %v676_v9, 0 }
 0x4a6   :  { %v209_v2 = vpack.c.bf16 %v208_v63, %v208_v63 }
 0x4a8   :  { %3021 = vmatmul.mubr.msk.bf16.vlgmr.msra.gmra.mrb[0].mxu0 %vm149_vm2, %v209_v2 }
 0x4a9   :  { %3031 = vmatpush3.bf16.msra.mxu0 %v329_v3  ;;  %3032 = vmatprep.mubr.msk.bf16.mxu0 %vm3480_vm1, %v3479_v15 }
 0x4aa   :  { %3042 = vmatprep.subr.bf16.mxu0 %v3479_v15 }
 0x4ab   :  { %v3394_v4 = vpop.eup %3393 }
 0x4ac   :  { %v321_v44 = vmul.f32 %v3394_v4, %v3721_v13 }
 0x4ae   :  { %v322_v5 = vpack.c.bf16 %v321_v44, %v321_v44 }
 0x4b0   :  { %3033 = vmatmul.mubr.msk.bf16.vlgmr.msra.gmra.mrb[4].mxu0 %vm149_vm2, %v322_v5 }
 0x4b1   :  { %3043 = vmatpush3.bf16.msra.mxu0 %v441_v6  ;;  %3044 = vmatprep.mubr.msk.bf16.mxu0 %vm3480_vm1, %v3479_v15 }
 0x4b2   :  { %3054 = vmatprep.subr.bf16.mxu0 %v3479_v15 }
 0x4cd   :  { %v431_v8 = vpop.xlane.xlu0 %430 }
 0x4ce   :  { %3395 = vrcp.f32 %v431_v8 }
 0x4d1   :  { %v548_v16 = vpop.permute.xlu0 %547 }
 0x4d2   :  { %v553_v18 = vsel %vm215_vm4, %v548_v16, 0 }
 0x4d5   :  { %v543_v10 = vpop.xlane.xlu1 %542 }
 0x4d6   :  { %3397 = vrcp.f32 %v543_v10 }
 0x4d8   :  { %v3396_v11 = vpop.eup %3395 }
 0x4d9   :  { %v433_v12 = vmul.f32 %v3396_v11, %v3380_v39  ;;  %v671_v14 = vpop.xlane.xlu1 %670  ;;  %v3343_v11 = vld [vmem:[%s4236_s3] sm:$0xff]  }
 0x4da   :  { %3399 = vrcp.f32 %v671_v14  ;;  %3109 = vmatpush3.bf16.msra.mxu1 %v3343_v11 }
 0x4db   :  { %v434_v17 = vpack.c.bf16 %v433_v12, %v433_v12  ;;  %3110 = vmatprep.subr.bf16.mxu1 %v3479_v15 }
 0x4dd   :  { %3045 = vmatmul.mubr.msk.bf16.vlgmr.msra.gmra.mrb[8].mxu0 %vm149_vm2, %v434_v17  ;;  %v783_v19 = vpop.xlane.xlu1 %782 }
 0x4de   :  { %3055 = vmatpush3.bf16.msra.mxu0 %v553_v18  ;;  %3056 = vmatprep.mubr.msk.bf16.mxu0 %vm3480_vm1, %v3479_v15  ;;  %3401 = vrcp.f32 %v783_v19  ;;  %v3344_v19 = vld [vmem:[%s4236_s3 + $0x8] sm:$0xff]  }
 0x4df   :  { %3066 = vmatprep.subr.bf16.mxu0 %v3479_v15  ;;  %3111 = vmatpush3.bf16.msra.mxu1 %v3344_v19  ;;  %v3877_v19 = vsub.s32 2, %v3581_v24 }
 0x4e0   :  { %v3398_v20 = vpop.eup %3397  ;;  %3124 = vmatprep.subr.bf16.mxu1 %v3479_v15 }
 0x4e1   :  { %v545_v22 = vmul.f32 %v3398_v20, %v3729_v43  ;;  %v788_v29 = vpop.permute.xlu1 %787 }
 0x4e2   :  { %v793_v21 = vsel %vm215_vm4, %v788_v29, 0 }
 0x4e3   :  { %v546_v23 = vpack.c.bf16 %v545_v22, %v545_v22 }
 0x4e4   :  { %v3400_v13 = vpop.eup %3399 }
 0x4e5   :  { %3057 = vmatmul.mubr.msk.bf16.vlgmr.msra.gmra.mrb[12].mxu0 %vm149_vm2, %v546_v23  ;;  %v673_v28 = vmul.f32 %v3400_v13, %v3733_v47 }
 0x4e6   :  { %3067 = vmatpush3.bf16.msra.mxu0 %v681_v27  ;;  %3068 = vmatprep.mubr.msk.bf16.mxu0 %vm3480_vm1, %v3479_v15 }
 0x4e7   :  { %3078 = vmatprep.subr.bf16.mxu0 %v3479_v15  ;;  %v674_v31 = vpack.c.bf16 %v673_v28, %v673_v28 }
 0x4e8   :  { %v3402_v32 = vpop.eup %3401 }
 0x4e9   :  { %v785_v33 = vmul.f32 %v3402_v32, %v3737_v48 }
 0x4eb   :  { %v786_v34 = vpack.c.bf16 %v785_v33, %v785_v33 }
 0x4ed   :  { %3069 = vmatmul.mubr.msk.bf16.vlgmr.msra.gmra.mrb[16].mxu0 %vm149_vm2, %v674_v31 }
 0x4ee   :  { %3079 = vmatpush3.bf16.msra.mxu0 %v793_v21  ;;  %3080 = vmatprep.mubr.msk.bf16.mxu0 %vm3480_vm1, %v3479_v15 }
 0x4ef   :  { %3090 = vmatprep.subr.bf16.mxu0 %v3479_v15 }
 0x4f5   :  { %3081 = vmatmul.mubr.msk.bf16.vlgmr.msra.gmra.mrb[20].mxu0 %vm149_vm2, %v786_v34 }
 0x4f6   :  { %3092 = vmatprep.mubr.msk.bf16.mxu0 %vm3480_vm1, %v3479_v15 }
 0x502   :  { %v895_v35 = vpop.xlane.xlu0 %894 }
 0x503   :  { %3403 = vrcp.f32 %v895_v35 }
 0x506   :  { %v900_v36 = vpop.permute.xlu0 %899 }
 0x507   :  { %v905_v37 = vsel %vm215_vm4, %v900_v36, 0 }
 0x508   :  { %3091 = vmatpush3.bf16.msra.mxu0 %v905_v37 }
 0x509   :  { %3102 = vmatprep.subr.bf16.mxu0 %v3479_v15 }
 0x50d   :  { %v3404_v38 = vpop.eup %3403 }
 0x50e   :  { %v897_v39 = vmul.f32 %v3404_v38, %v3746_v55 }
 0x510   :  { %v898_v40 = vpack.c.bf16 %v897_v39, %v897_v39 }
 0x512   :  { %3093 = vmatmul.mubr.msk.bf16.vlgmr.msra.gmra.mrb[24].mxu0 %vm149_vm2, %v898_v40  ;;  %v1007_v41 = vpop.xlane.xlu1 %1006 }
 0x513   :  { %3405 = vrcp.f32 %v1007_v41  ;;  %3104 = vmatprep.mubr.msk.bf16.mxu0 %vm3480_vm1, %v3479_v15 }
 0x516   :  { %v1012_v43 = vpop.permute.xlu1 %1011 }
 0x517   :  { %v1017_v45 = vsel %vm215_vm4, %v1012_v43, 0 }
 0x518   :  { %3103 = vmatpush3.bf16.msra.mxu0 %v1017_v45 }
 0x519   :  { %3116 = vmatprep.subr.bf16.mxu0 %v3479_v15 }
 0x51d   :  { %v3406_v47 = vpop.eup %3405 }
 0x51e   :  { %v1009_v46 = vmul.f32 %v3406_v47, %v3750_v58  ;;  %v3826_v47 = vld [vmem:[%s4239_s6] sm:$0x7] }
 0x520   :  { %v1010_v48 = vpack.c.bf16 %v1009_v46, %v1009_v46  ;;  %v1082_v46 = vrot.slane %v3826_v47, %v3584_v25 }
 0x522   :  { %3105 = vmatmul.mubr.msk.bf16.vlgmr.msra.gmra.mrb[28].mxu0 %vm149_vm2, %v1010_v48 }
 0x523   :  { %3120 = vmatprep.mubr.msk.bf16.mxu0 %vm3480_vm1, %v3479_v15 }
 0x57b   :  { %v253_v49 = vpop.f32.mrb[0].mxu0 }
 0x57c   :  { %v3022_v50 = vpop.f32.mrb[1].mxu0 }
 0x57d   :  { %v256_v51 = vpop.f32.mrb[2].mxu0 }
 0x57e   :  { %v3023_v52 = vpop.f32.mrb[3].mxu0 }
 0x583   :  { %v365_v53 = vpop.f32.mrb[4].mxu0 }
 0x584   :  { %v3034_v54 = vpop.f32.mrb[5].mxu0 }
 0x585   :  { %v368_v55 = vpop.f32.mrb[6].mxu0 }
 0x586   :  { %v3035_v56 = vpop.f32.mrb[7].mxu0 }
 0x5b0   :  { %v477_v57 = vpop.f32.mrb[8].mxu0 }
 0x5b1   :  { %v3046_v42 = vpop.f32.mrb[9].mxu0 }
 0x5b2   :  { %v480_v59 = vpop.f32.mrb[10].mxu0 }
 0x5b3   :  { %v3047_v60 = vpop.f32.mrb[11].mxu0 }
 0x5b8   :  { %v589_v61 = vpop.f32.mrb[12].mxu0 }
 0x5b9   :  { %v3058_v58 = vpop.f32.mrb[13].mxu0 }
 0x5ba   :  { %v592_v62 = vpop.f32.mrb[14].mxu0 }
 0x5bb   :  { %v3059_v63 = vpop.f32.mrb[15].mxu0 }
 0x5c0   :  { %v717_v2 = vpop.f32.mrb[16].mxu0 }
 0x5c1   :  { %v3070_v3 = vpop.f32.mrb[17].mxu0 }
 0x5c2   :  { %v720_v4 = vpop.f32.mrb[18].mxu0  ;;  %v3345_v3 = vld [vmem:[%s4237_s4] sm:$0xff]  }
 0x5c3   :  { %v3071_v44 = vpop.f32.mrb[19].mxu0  ;;  %3117 = vmatpush3.bf16.msra.mxu0 %v3345_v3  ;;  %v3346_v4 = vld [vmem:[%s4237_s4 + $0x8] sm:$0xff]  }
 0x5c4   :  { %3118 = vmatprep.subr.bf16.mxu0 %v3479_v15  ;;  %v3347_v44 = vld [vmem:[%s4238_s5] sm:$0xff]  }
 0x5c7   :  { %3119 = vmatpush3.bf16.msra.mxu0 %v3346_v4  ;;  %v3355_v4 = vld [vmem:[%s4235_s2 + $0x10] sm:$0xff]  }
 0x5c8   :  { %v829_v5 = vpop.f32.mrb[20].mxu0  ;;  %3144 = vmatprep.subr.bf16.mxu0 %v3479_v15 }
 0x5c9   :  { %v3311_v6 = vpack.i.bf16 %v829_v5, %v365_v53  ;;  %v3082_v8 = vpop.f32.mrb[21].mxu0  ;;  %v3348_v5 = vld [vmem:[%s4238_s5 + $0x8] sm:$0xff]  }
 0x5ca   :  { %v832_v9 = vpop.f32.mrb[22].mxu0  ;;  %v3350_v8 = vld [vmem:[%s4238_s5 + $0x18] sm:$0xff]  }
 0x5cb   :  { %3312 = vrot.lane.b32.xlu0 %v3311_v6, %s3493_s29  ;;  %v3083_v10 = vpop.f32.mrb[23].mxu0  ;;  %v3349_v6 = vld [vmem:[%s4238_s5 + $0x10] sm:$0xff]   ;;  %v3351_v9 = vld [vmem:[%s4238_s5 + $0x20] sm:$0xff]  }
 0x5cc   :  { %v3352_v10 = vld [vmem:[%s4238_s5 + $0x28] sm:$0xff]  }
 0x5e5   :  { %v941_v12 = vpop.f32.mrb[24].mxu0 }
 0x5e6   :  { %v3316_v14 = vpack.i.bf16 %v941_v12, %v477_v57  ;;  %v3094_v16 = vpop.f32.mrb[25].mxu0 }
 0x5e7   :  { %v944_v17 = vpop.f32.mrb[26].mxu0 }
 0x5e8   :  { %3317 = vrot.lane.b32.xlu1 %v3316_v14, %s3494_s11  ;;  %v3095_v18 = vpop.f32.mrb[27].mxu0 }
 0x5f5   :  { %v1053_v20 = vpop.f32.mrb[28].mxu0 }
 0x5f6   :  { %v3321_v22 = vpack.i.bf16 %v1053_v20, %v589_v61  ;;  %v3106_v23 = vpop.f32.mrb[29].mxu0 }
 0x5f7   :  { %v1056_v13 = vpop.f32.mrb[30].mxu0 }
 0x5f8   :  { %3322 = vrot.lane.b32.xlu0 %v3321_v22, %s3495_s13  ;;  %v3107_v27 = vpop.f32.mrb[31].mxu0  ;;  %v1170_v22 = vrot.slane %v3589_v26, %v3877_v19  ;;  %v1175_v13 = vsub.s32 3, %v3581_v24  ;;  %v3368_v24 = vld [vmem:[%s4238_s5 + $0x78] sm:$0xff]  }
 0x63d   :  { %v3313_v28 = vpop.permute.xlu0 %3312 }
 0x63e   :  { %v3315_v31 = vunpack.i.h.bf16 %v3313_v28  ;;  %v3314_v32 = vunpack.i.l.bf16 %v3313_v28 }
 0x640   :  { %v1071_v35 = vsel %vm149_vm2, %v717_v2, %v3315_v31  ;;  %v607_v36 = vsel %vm149_vm2, %v253_v49, %v3314_v32  ;;  %v1176_v31 = vrot.slane %v3589_v26, %v1175_v13  ;;  %v3354_v26 = vld [vmem:[%s4238_s5 + $0x38] sm:$0xff]  }
 0x65a   :  { %v3318_v29 = vpop.permute.xlu1 %3317 }
 0x65b   :  { %v3320_v21 = vunpack.i.h.bf16 %v3318_v29  ;;  %v3319_v33 = vunpack.i.l.bf16 %v3318_v29 }
 0x65d   :  { %v1072_v39 = vsel %vm608_vm5, %v1071_v35, %v3320_v21  ;;  %v609_v40 = vsel %vm608_vm5, %v607_v36, %v3319_v33  ;;  %v3353_v35 = vld [vmem:[%s4238_s5 + $0x30] sm:$0xff]   ;;  %v1187_v36 = vrot.slane %v3826_v47, %v3594_v30 }
 0x66a   :  { %v3323_v34 = vpop.permute.xlu0 %3322 }
 0x66b   :  { %v3325_v37 = vunpack.i.h.bf16 %v3323_v34  ;;  %v3324_v38 = vunpack.i.l.bf16 %v3323_v34 }
 0x66d   :  { %v611_v41 = vsel %vm610_vm6, %v609_v40, %v3324_v38  ;;  %v1073_v43 = vsel %vm610_vm6, %v1072_v39, %v3325_v37 }
 0x66e   :  { %v1074_v45 = vpack.c.bf16 %v1073_v43, %v611_v41 }
 0x670   :  { %3113 = vmatmul.mubr.msk.bf16.vlgmr.msra.gmra.mrb[36].mxu1 %vm44_vm0, %v1074_v45 }
 0x671   :  { %3140 = vmatprep.mubr.msk.bf16.mxu1 %vm3480_vm1, %v3479_v15  ;;  %3125 = vmatpush3.bf16.msra.mxu1 %v3347_v44  ;;  %v3356_v44 = vld [vmem:[%s4235_s2 + $0x18] sm:$0xff]  }
 0x672   :  { %3126 = vmatprep.subr.bf16.mxu1 %v3479_v15 }
 0x675   :  { %3127 = vmatpush3.bf16.msra.mxu1 %v3348_v5 }
 0x676   :  { %3128 = vmatprep.subr.bf16.mxu1 %v3479_v15 }
 0x679   :  { %3129 = vmatpush3.bf16.msra.mxu1 %v3349_v6 }
 0x67a   :  { %3130 = vmatprep.subr.bf16.mxu1 %v3479_v15 }
 0x67d   :  { %3131 = vmatpush3.bf16.msra.mxu1 %v3350_v8 }
 0x67e   :  { %3132 = vmatprep.subr.bf16.mxu1 %v3479_v15 }
 0x681   :  { %3133 = vmatpush3.bf16.msra.mxu1 %v3351_v9 }
 0x682   :  { %3134 = vmatprep.subr.bf16.mxu1 %v3479_v15 }
 0x685   :  { %3135 = vmatpush3.bf16.msra.mxu1 %v3352_v10 }
 0x686   :  { %3136 = vmatprep.subr.bf16.mxu1 %v3479_v15 }
 0x689   :  { %3137 = vmatpush3.bf16.msra.mxu1 %v3353_v35 }
 0x68a   :  { %3138 = vmatprep.subr.bf16.mxu1 %v3479_v15 }
 0x68d   :  { %3139 = vmatpush3.bf16.msra.mxu1 %v3354_v26 }
 0x68e   :  { %3170 = vmatprep.subr.bf16.mxu1 %v3479_v15 }
 0x743   :  { %v1132_v48 = vpop.f32.mrb[36].mxu1 }
 0x744   :  { %v1133_v49 = vadd.f32 %v1132_v48, %v1082_v46  ;;  %v3114_v50 = vpop.f32.mrb[37].mxu1 }
 0x745   :  { %v1135_v51 = vpop.f32.mrb[38].mxu1 }
 0x746   :  { %v3831_v52 = vadd.f32 %v1133_v49, %v3551_v0  ;;  %v1136_v53 = vadd.f32 %v1135_v51, %v1082_v46  ;;  %v3115_v54 = vpop.f32.mrb[39].mxu1  ;;  %v1266_v49 = vrot.slane %v3826_v47, %v3877_v19 }
 0x748   :  { %v3834_v55 = vadd.f32 %v1136_v53, %v3556_v1  ;;  %v1141_v56 = vsel %vm44_vm0, %v3831_v52, 0.0 }
 0x749   :  { %1142 = vadd.xlane.f32.xlu1 %v1141_v56 }
 0x74a   :  { %v1144_v57 = vsel %vm44_vm0, %v3834_v55, 0.0 }
 0x74b   :  { %1145 = vadd.xlane.f32.xlu0 %v1144_v57 }
 0x7d6   :  { %v1143_v42 = vpop.xlane.xlu1 %1142 }
 0x7d7   :  { %v1147_v59 = vmul.f32 0.03125, %v1143_v42 }
 0x7d8   :  { %v1146_v60 = vpop.xlane.xlu0 %1145 }
 0x7d9   :  { %v1149_v61 = vsub.f32 %v3831_v52, %v1147_v59  ;;  %v1148_v0 = vmul.f32 0.03125, %v1146_v60 }
 0x7db   :  { %v1150_v58 = vsub.f32 %v3834_v55, %v1148_v0  ;;  %v1151_v62 = vmul.f32 %v1149_v61, %v1149_v61 }
 0x7dd   :  { %v1153_v1 = vsel %vm44_vm0, %v1151_v62, 0.0  ;;  %v1152_v63 = vmul.f32 %v1150_v58, %v1150_v58 }
 0x7de   :  { %1154 = vadd.xlane.f32.xlu0 %v1153_v1 }
 0x7df   :  { %v1156_v2 = vsel %vm44_vm0, %v1152_v63, 0.0 }
 0x7e2   :  { %1157 = vadd.xlane.f32.xlu0 %v1156_v2 }
 0x86b   :  { %v1155_v11 = vpop.xlane.xlu0 %1154 }
 0x86c   :  { %v1159_v12 = vmul.f32 0.03125, %v1155_v11 }
 0x86e   :  { %v1161_v14 = vadd.f32 1e-05, %v1159_v12  ;;  %v3927_v12 = vld [vmem:[%s4234_s1 + $0x4] sm:$0xf] }
 0x86f   :  { %v1158_v16 = vpop.xlane.xlu0 %1157 }
 0x870   :  { %3407 = vrsqrt.f32 %v1161_v14  ;;  %v1160_v17 = vmul.f32 0.03125, %v1158_v16  ;;  %v1391_v14 = vrot.slane %v3927_v12, %v3584_v25 }
 0x872   :  { %v1162_v18 = vadd.f32 1e-05, %v1160_v17 }
 0x874   :  { %3409 = vrsqrt.f32 %v1162_v18 }
 0x87a   :  { %v3408_v20 = vpop.eup %3407 }
 0x87b   :  { %v1165_v23 = vmul.f32 %v3408_v20, %v1149_v61 }
 0x87d   :  { %v1171_v28 = vmul.f32 %v1170_v22, %v1165_v23  ;;  %v1397_v23 = vrot.slane %v3927_v12, %v3594_v30 }
 0x87e   :  { %v3410_v27 = vpop.eup %3409 }
 0x87f   :  { %v1166_v29 = vmul.f32 %v3410_v27, %v1150_v58  ;;  %v1177_v21 = vadd.f32 %v1176_v31, %v1171_v28 }
 0x881   :  { %v1172_v32 = vmul.f32 %v1170_v22, %v1166_v29 }
 0x883   :  { %v1178_v33 = vadd.f32 %v1176_v31, %v1172_v32 }
 0x885   :  { %v1179_v34 = vpack.c.bf16 %v1178_v33, %v1177_v21 }
 0x887   :  { %3121 = vmatmul.mubr.msk.bf16.vlgmr.msra.gmra.mrb[32].mxu0 %vm44_vm0, %v1179_v34 }
 0x888   :  { %3148 = vmatprep.mubr.msk.bf16.mxu0 %vm3480_vm1, %v3479_v15  ;;  %3145 = vmatpush3.bf16.msra.mxu0 %v3355_v4 }
 0x889   :  { %3146 = vmatprep.subr.bf16.mxu0 %v3479_v15 }
 0x88c   :  { %3147 = vmatpush3.bf16.msra.mxu0 %v3356_v44 }
 0x88d   :  { %3152 = vmatprep.subr.bf16.mxu0 %v3479_v15 }
 0x95a   :  { %v1237_v37 = vpop.f32.mrb[32].mxu0 }
 0x95b   :  { %v1238_v38 = vadd.f32 %v1237_v37, %v1187_v36  ;;  %v3122_v39 = vpop.f32.mrb[33].mxu0 }
 0x95c   :  { %v1240_v40 = vpop.f32.mrb[34].mxu0 }
 0x95d   :  { %v1241_v41 = vadd.f32 %v1240_v40, %v1187_v36  ;;  %v3123_v43 = vpop.f32.mrb[35].mxu0  ;;  %v1244_v45 = vmax.f32 %v1238_v38, 0.0 }
 0x95f   :  { %v1245_v46 = vmax.f32 %v1241_v41, 0.0 }
 0x961   :  { %v1246_v48 = vpack.c.bf16 %v1245_v46, %v1244_v45 }
 0x963   :  { %3141 = vmatmul.mubr.bf16.vlgmr.msra.gmra.mrb[40].mxu1 %v1246_v48 }
 0x964   :  { %3172 = vmatprep.mubr.msk.bf16.mxu1 %vm3480_vm1, %v3479_v15 }
 0xa36   :  { %v1349_v50 = vpop.f32.mrb[40].mxu1 }
 0xa37   :  { %v1350_v51 = vadd.f32 %v1349_v50, %v1266_v49  ;;  %v3142_v53 = vpop.f32.mrb[41].mxu1 }
 0xa38   :  { %v1352_v54 = vpop.f32.mrb[42].mxu1 }
 0xa39   :  { %v3903_v56 = vadd.f32 %v1350_v51, %v3831_v52  ;;  %v1353_v57 = vadd.f32 %v1352_v54, %v1266_v49  ;;  %v3143_v42 = vpop.f32.mrb[43].mxu1 }
 0xa3b   :  { %v3906_v59 = vadd.f32 %v1353_v57, %v3834_v55  ;;  %v1362_v60 = vsel %vm44_vm0, %v3903_v56, 0.0 }
 0xa3c   :  { %1363 = vadd.xlane.f32.xlu1 %v1362_v60 }
 0xa3d   :  { %v1365_v61 = vsel %vm44_vm0, %v3906_v59, 0.0 }
 0xa3e   :  { %1366 = vadd.xlane.f32.xlu0 %v1365_v61 }
 0xac9   :  { %v1364_v47 = vpop.xlane.xlu1 %1363 }
 0xaca   :  { %v1368_v0 = vmul.f32 0.03125, %v1364_v47 }
 0xacb   :  { %v1367_v58 = vpop.xlane.xlu0 %1366 }
 0xacc   :  { %v1370_v62 = vsub.f32 %v3903_v56, %v1368_v0  ;;  %v1369_v52 = vmul.f32 0.03125, %v1367_v58 }
 0xace   :  { %v1371_v1 = vsub.f32 %v3906_v59, %v1369_v52  ;;  %v1372_v63 = vmul.f32 %v1370_v62, %v1370_v62 }
 0xad0   :  { %v1374_v55 = vsel %vm44_vm0, %v1372_v63, 0.0  ;;  %v1373_v2 = vmul.f32 %v1371_v1, %v1371_v1 }
 0xad1   :  { %1375 = vadd.xlane.f32.xlu1 %v1374_v55 }
 0xad2   :  { %v1377_v3 = vsel %vm44_vm0, %v1373_v2, 0.0 }
 0xad3   :  { %1378 = vadd.xlane.f32.xlu0 %v1377_v3 }
 0xb5e   :  { %v1376_v5 = vpop.xlane.xlu1 %1375 }
 0xb5f   :  { %v1380_v6 = vmul.f32 0.03125, %v1376_v5 }
 0xb60   :  { %v1379_v8 = vpop.xlane.xlu0 %1378 }
 0xb61   :  { %v1382_v9 = vadd.f32 1e-05, %v1380_v6  ;;  %v1381_v10 = vmul.f32 0.03125, %v1379_v8 }
 0xb63   :  { %3411 = vrsqrt.f32 %v1382_v9  ;;  %v1383_v11 = vadd.f32 1e-05, %v1381_v10 }
 0xb65   :  { %3413 = vrsqrt.f32 %v1383_v11 }
 0xb6d   :  { %v3412_v16 = vpop.eup %3411 }
 0xb6e   :  { %v1386_v17 = vmul.f32 %v3412_v16, %v1370_v62 }
 0xb6f   :  { %v3414_v18 = vpop.eup %3413 }
 0xb70   :  { %v1392_v20 = vmul.f32 %v1391_v14, %v1386_v17  ;;  %v1387_v22 = vmul.f32 %v3414_v18, %v1371_v1 }
 0xb72   :  { %v1393_v27 = vmul.f32 %v1391_v14, %v1387_v22  ;;  %v1398_v28 = vadd.f32 %v1397_v23, %v1392_v20 }
 0xb74   :  { %v1399_v29 = vadd.f32 %v1397_v23, %v1393_v27 }
 0xb76   :  { %v1400_v31 = vpack.c.bf16 %v1399_v29, %v1398_v28 }
 0xb78   :  { %3149 = vmatmul.mubr.msk.bf16.vlgmr.msra.gmra.mrb[36].mxu0 %vm44_vm0, %v1400_v31 }
 0xb79   :  { %3154 = vmatprep.mubr.msk.bf16.mxu0 %vm3480_vm1, %v3479_v15 }
 0xc4b   :  { %v1455_v32 = vpop.f32.mrb[36].mxu0 }
 0xc4c   :  { %v3150_v21 = vpop.f32.mrb[37].mxu0 }
 0xc4d   :  { %v1458_v33 = vpop.f32.mrb[38].mxu0 }
 0xc4e   :  { %v3936_v34 = vpack.c.bf16 %v1458_v33, %v1455_v32  ;;  %v3151_v35 = vpop.f32.mrb[39].mxu0 }
 0xc50   :  { %1464 = vrot.lane.b32.xlu1 %v3936_v34, %s3482_s19  ;;  %v3951_v26 = vrot.slane %v3936_v34, 4 }
 0xc54   :  { %1576 = vrot.lane.b32.xlu1 %v3936_v34, %s3481_s18 }
 0xc58   :  { %1574 = vrot.lane.b32.xlu1 %v3936_v34, %s3483_s20 }
 0xc5c   :  { %1688 = vrot.lane.b32.xlu1 %v3936_v34, %s3485_s22 }
 0xc60   :  { %1686 = vrot.lane.b32.xlu1 %v3936_v34, %s3484_s21 }
 0xc64   :  { %1800 = vrot.lane.b32.xlu1 %v3936_v34, %s3487_s24 }
 0xc68   :  { %1926 = vrot.lane.b32.xlu1 %v3951_v26, %s3482_s19 }
 0xc6c   :  { %2036 = vrot.lane.b32.xlu1 %v3951_v26, %s3483_s20 }
 0xc70   :  { %2148 = vrot.lane.b32.xlu1 %v3951_v26, %s3484_s21 }
 0xc74   :  { %2260 = vrot.lane.b32.xlu1 %v3951_v26, %s3486_s23 }
 0xcc2   :  { %v1465_v36 = vpop.permute.xlu1 %1464 }
 0xcc3   :  { %v1470_v37 = vsel %vm149_vm2, %v1465_v36, 0 }
 0xcc4   :  { %3153 = vmatpush3.bf16.xpose.msra.mxu0 %v1470_v37 }
 0xcc5   :  { %3158 = vmatprep.subr.bf16.mxu0 %v3479_v15 }
 0xcc6   :  { %v1577_v42 = vpop.permute.xlu1 %1576 }
 0xcc7   :  { %v1582_v62 = vsel %vm149_vm2, %v1577_v42, 0 }
 0xcca   :  { %v1575_v47 = vpop.permute.xlu1 %1574 }
 0xccb   :  { %3155 = vmatmul.mubr.msk.bf16.vlgmr.msra.gmra.mrb[40].mxu0 %vm149_vm2, %v3936_v34 }
 0xccc   :  { %3160 = vmatprep.mubr.msk.bf16.mxu0 %vm3480_vm1, %v3479_v15 }
 0xcce   :  { %v1689_v52 = vpop.permute.xlu1 %1688 }
 0xccf   :  { %v1694_v63 = vsel %vm149_vm2, %v1689_v52, 0 }
 0xcd2   :  { %v1687_v1 = vpop.permute.xlu1 %1686 }
 0xcd6   :  { %v1801_v55 = vpop.permute.xlu1 %1800 }
 0xcd7   :  { %v1806_v2 = vsel %vm149_vm2, %v1801_v55, 0 }
 0xcda   :  { %v1927_v3 = vpop.permute.xlu1 %1926 }
 0xcdb   :  { %v1932_v44 = vsel %vm149_vm2, %v1927_v3, 0 }
 0xcde   :  { %v2037_v9 = vpop.permute.xlu1 %2036 }
 0xce2   :  { %v2149_v14 = vpop.permute.xlu1 %2148 }
 0xce6   :  { %v2261_v17 = vpop.permute.xlu1 %2260 }
 0xd9e   :  { %v1506_v38 = vpop.f32.mrb[40].mxu0 }
 0xd9f   :  { %v1512_v39 = vmul.f32 0.17677669, %v1506_v38  ;;  %v3156_v40 = vpop.f32.mrb[41].mxu0 }
 0xda0   :  { %v1509_v41 = vpop.f32.mrb[42].mxu0 }
 0xda1   :  { %v3157_v43 = vpop.f32.mrb[43].mxu0  ;;  %v1513_v45 = vadd.f32 %v1512_v39, %v3680_v7 }
 0xda3   :  { %v1514_v46 = vsel %vm149_vm2, %v1513_v45, -inf }
 0xda4   :  { %1515 = vmax.xlane.f32.xlu0 %v1514_v46 }
 0xe31   :  { %v1516_v48 = vpop.xlane.xlu0 %1515 }
 0xe32   :  { %v1517_v49 = vsub.f32 %v1513_v45, %v1516_v48 }
 0xe34   :  { %v1518_v50 = vmul.f32 1.442695, %v1517_v49 }
 0xe36   :  { %3415 = vpow2.f32 %v1518_v50 }
 0xe40   :  { %v3416_v51 = vpop.eup %3415 }
 0xe41   :  { %v1520_v53 = vsel %vm149_vm2, %v3416_v51, 0.0 }
 0xe42   :  { %1521 = vadd.xlane.f32.xlu0 %v1520_v53 }
 0xe58   :  { %1526 = vrot.lane.b32.xlu0 %v3936_v34, %s3490_s26 }
 0xe5c   :  { %1798 = vrot.lane.b32.xlu0 %v3936_v34, %s3486_s23 }
 0xe60   :  { %2038 = vrot.lane.b32.xlu0 %v3951_v26, %s3481_s18 }
 0xe64   :  { %2150 = vrot.lane.b32.xlu0 %v3951_v26, %s3485_s22 }
 0xe68   :  { %2262 = vrot.lane.b32.xlu0 %v3951_v26, %s3487_s24 }
 0xecf   :  { %v1522_v54 = vpop.xlane.xlu0 %1521 }
 0xed0   :  { %3417 = vrcp.f32 %v1522_v54 }
 0xed3   :  { %v1527_v57 = vpop.permute.xlu0 %1526 }
 0xed4   :  { %v1532_v60 = vsel %vm215_vm4, %v1527_v57, 0 }
 0xed5   :  { %3159 = vmatpush3.bf16.msra.mxu0 %v1532_v60 }
 0xed6   :  { %3164 = vmatprep.subr.bf16.mxu0 %v3479_v15 }
 0xed7   :  { %v1799_v4 = vpop.permute.xlu0 %1798 }
 0xeda   :  { %v3418_v61 = vpop.eup %3417 }
 0xedb   :  { %v1524_v0 = vmul.f32 %v3418_v61, %v3416_v51  ;;  %v2039_v5 = vpop.permute.xlu0 %2038 }
 0xedc   :  { %v2044_v6 = vsel %vm149_vm2, %v2039_v5, 0 }
 0xedd   :  { %v1525_v58 = vpack.c.bf16 %v1524_v0, %v1524_v0 }
 0xedf   :  { %3161 = vmatmul.mubr.msk.bf16.vlgmr.msra.gmra.mrb[44].mxu0 %vm149_vm2, %v1525_v58  ;;  %v2151_v8 = vpop.permute.xlu0 %2150 }
 0xee0   :  { %3165 = vmatpush3.bf16.xpose.msra.mxu0 %v1582_v62  ;;  %3166 = vmatprep.mubr.msk.bf16.mxu0 %vm3480_vm1, %v3479_v15  ;;  %v2156_v10 = vsel %vm149_vm2, %v2151_v8, 0 }
 0xee1   :  { %3176 = vmatprep.subr.bf16.mxu0 %v3479_v15 }
 0xee3   :  { %v2263_v11 = vpop.permute.xlu0 %2262 }
 0xee4   :  { %v2268_v16 = vsel %vm149_vm2, %v2263_v11, 0 }
 0xee7   :  { %3167 = vmatmul.mubr.msk.bf16.vlgmr.msra.gmra.mrb[48].mxu0 %vm149_vm2, %v1575_v47 }
 0xee8   :  { %3177 = vmatpush3.bf16.xpose.msra.mxu0 %v1694_v63  ;;  %3178 = vmatprep.mubr.msk.bf16.mxu0 %vm3480_vm1, %v3479_v15 }
 0xee9   :  { %3188 = vmatprep.subr.bf16.mxu0 %v3479_v15 }
 0xeef   :  { %3179 = vmatmul.mubr.msk.bf16.vlgmr.msra.gmra.mrb[52].mxu0 %vm149_vm2, %v1687_v1 }
 0xef0   :  { %3189 = vmatpush3.bf16.xpose.msra.mxu0 %v1806_v2  ;;  %3190 = vmatprep.mubr.msk.bf16.mxu0 %vm3480_vm1, %v3479_v15 }
 0xef1   :  { %3200 = vmatprep.subr.bf16.mxu0 %v3479_v15 }
 0xef7   :  { %3191 = vmatmul.mubr.msk.bf16.vlgmr.msra.gmra.mrb[56].mxu0 %vm149_vm2, %v1799_v4 }
 0xef8   :  { %3201 = vmatpush3.bf16.xpose.msra.mxu0 %v1932_v44  ;;  %3202 = vmatprep.mubr.msk.bf16.mxu0 %vm3480_vm1, %v3479_v15 }
 0xef9   :  { %3212 = vmatprep.subr.bf16.mxu0 %v3479_v15 }
 0xeff   :  { %3203 = vmatmul.mubr.msk.bf16.vlgmr.msra.gmra.mrb[60].mxu0 %vm149_vm2, %v3951_v26 }
 0xf00   :  { %3213 = vmatpush3.bf16.xpose.msra.mxu0 %v2044_v6  ;;  %3214 = vmatprep.mubr.msk.bf16.mxu0 %vm3480_vm1, %v3479_v15 }
 0xf01   :  { %3224 = vmatprep.subr.bf16.mxu0 %v3479_v15 }
 0xf07   :  { %3215 = vmatmul.mubr.msk.bf16.vlgmr.msra.gmra.mrb[64].mxu0 %vm149_vm2, %v2037_v9 }
 0xf08   :  { %3225 = vmatpush3.bf16.xpose.msra.mxu0 %v2156_v10  ;;  %3226 = vmatprep.mubr.msk.bf16.mxu0 %vm3480_vm1, %v3479_v15 }
 0xf09   :  { %3236 = vmatprep.subr.bf16.mxu0 %v3479_v15 }
 0xf0f   :  { %3227 = vmatmul.mubr.msk.bf16.vlgmr.msra.gmra.mrb[68].mxu0 %vm149_vm2, %v2149_v14 }
 0xf10   :  { %3237 = vmatpush3.bf16.xpose.msra.mxu0 %v2268_v16  ;;  %3238 = vmatprep.mubr.msk.bf16.mxu0 %vm3480_vm1, %v3479_v15 }
 0xf11   :  { %3248 = vmatprep.subr.bf16.mxu0 %v3479_v15 }
 0xf17   :  { %3239 = vmatmul.mubr.msk.bf16.vlgmr.msra.gmra.mrb[72].mxu0 %vm149_vm2, %v2261_v17 }
 0xf18   :  { %3252 = vmatprep.mubr.msk.bf16.mxu0 %vm3480_vm1, %v3479_v15 }
 0xfb2   :  { %v4021_v18 = vpop.f32.mrb[44].mxu0 }
 0xfb3   :  { %v3162_v20 = vpop.f32.mrb[45].mxu0 }
 0xfb4   :  { %v1571_v22 = vpop.f32.mrb[46].mxu0 }
 0xfb5   :  { %v3163_v23 = vpop.f32.mrb[47].mxu0 }
 0xfba   :  { %v1618_v27 = vpop.f32.mrb[48].mxu0 }
 0xfbb   :  { %v1624_v28 = vmul.f32 0.17677669, %v1618_v27  ;;  %v3168_v29 = vpop.f32.mrb[49].mxu0 }
 0xfbc   :  { %v1621_v31 = vpop.f32.mrb[50].mxu0 }
 0xfbd   :  { %v3169_v32 = vpop.f32.mrb[51].mxu0  ;;  %v1625_v21 = vadd.f32 %v1624_v28, %v3680_v7 }
 0xfbf   :  { %v1626_v33 = vsel %vm149_vm2, %v1625_v21, -inf }
 0xfc0   :  { %1627 = vmax.xlane.f32.xlu0 %v1626_v33 }
 0xfc2   :  { %v1730_v35 = vpop.f32.mrb[52].mxu0 }
 0xfc3   :  { %v1736_v36 = vmul.f32 0.17677669, %v1730_v35  ;;  %v3180_v37 = vpop.f32.mrb[53].mxu0 }
 0xfc4   :  { %v1733_v38 = vpop.f32.mrb[54].mxu0 }
 0xfc5   :  { %v3181_v39 = vpop.f32.mrb[55].mxu0  ;;  %v1737_v40 = vadd.f32 %v1736_v36, %v3680_v7 }
 0xfc7   :  { %v1738_v41 = vsel %vm149_vm2, %v1737_v40, -inf }
 0xfc8   :  { %1739 = vmax.xlane.f32.xlu1 %v1738_v41 }
 0xfca   :  { %v1842_v43 = vpop.f32.mrb[56].mxu0 }
 0xfcb   :  { %v1848_v45 = vmul.f32 0.17677669, %v1842_v43  ;;  %v3192_v46 = vpop.f32.mrb[57].mxu0 }
 0xfcc   :  { %v1845_v48 = vpop.f32.mrb[58].mxu0 }
 0xfcd   :  { %v3193_v49 = vpop.f32.mrb[59].mxu0  ;;  %v1849_v50 = vadd.f32 %v1848_v45, %v3680_v7 }
 0xfcf   :  { %v1850_v51 = vsel %vm149_vm2, %v1849_v50, -inf }
 0xfd0   :  { %1851 = vmax.xlane.f32.xlu0 %v1850_v51 }
 0xfd2   :  { %v1968_v53 = vpop.f32.mrb[60].mxu0 }
 0xfd3   :  { %v1974_v54 = vmul.f32 0.17677669, %v1968_v53  ;;  %v3204_v57 = vpop.f32.mrb[61].mxu0 }
 0xfd4   :  { %v1971_v42 = vpop.f32.mrb[62].mxu0 }
 0xfd5   :  { %v3205_v60 = vpop.f32.mrb[63].mxu0  ;;  %v1975_v61 = vadd.f32 %v1974_v54, %v3680_v7 }
 0xfd7   :  { %v1976_v47 = vsel %vm149_vm2, %v1975_v61, -inf }
 0xfd8   :  { %1977 = vmax.xlane.f32.xlu0 %v1976_v47 }
 0xfda   :  { %v2080_v0 = vpop.f32.mrb[64].mxu0 }
 0xfdb   :  { %v2086_v58 = vmul.f32 0.17677669, %v2080_v0  ;;  %v3216_v62 = vpop.f32.mrb[65].mxu0 }
 0xfdc   :  { %v2083_v52 = vpop.f32.mrb[66].mxu0 }
 0xfdd   :  { %v3217_v1 = vpop.f32.mrb[67].mxu0  ;;  %v2087_v63 = vadd.f32 %v2086_v58, %v3680_v7 }
 0xfdf   :  { %v2088_v55 = vsel %vm149_vm2, %v2087_v63, -inf }
 0xfe0   :  { %2089 = vmax.xlane.f32.xlu0 %v2088_v55 }
 0xfe2   :  { %v2192_v2 = vpop.f32.mrb[68].mxu0 }
 0xfe3   :  { %v2198_v3 = vmul.f32 0.17677669, %v2192_v2  ;;  %v3228_v4 = vpop.f32.mrb[69].mxu0 }
 0xfe4   :  { %v2195_v44 = vpop.f32.mrb[70].mxu0 }
 0xfe5   :  { %v3229_v5 = vpop.f32.mrb[71].mxu0  ;;  %v2199_v6 = vadd.f32 %v2198_v3, %v3680_v7 }
 0xfe7   :  { %v2200_v8 = vsel %vm149_vm2, %v2199_v6, -inf }
 0xfe8   :  { %2201 = vmax.xlane.f32.xlu1 %v2200_v8 }
 0xfea   :  { %v2304_v9 = vpop.f32.mrb[72].mxu0 }
 0xfeb   :  { %v2310_v10 = vmul.f32 0.17677669, %v2304_v9  ;;  %v3240_v11 = vpop.f32.mrb[73].mxu0 }
 0xfec   :  { %v2307_v14 = vpop.f32.mrb[74].mxu0 }
 0xfed   :  { %v3241_v16 = vpop.f32.mrb[75].mxu0  ;;  %v2311_v17 = vadd.f32 %v2310_v10, %v3680_v7 }
 0xfef   :  { %v2312_v20 = vsel %vm149_vm2, %v2311_v17, -inf }
 0xff0   :  { %2313 = vmax.xlane.f32.xlu0 %v2312_v20 }
 0xff9   :  { %1638 = vrot.lane.b32.xlu1 %v3936_v34, %s3488_s25 }
0x1006   :  { %1750 = vrot.lane.b32.xlu0 %v3936_v34, %s3491_s27 }
0x104d   :  { %v1628_v22 = vpop.xlane.xlu0 %1627 }
0x104e   :  { %v1629_v23 = vsub.f32 %v1625_v21, %v1628_v22 }
0x1050   :  { %v1630_v27 = vmul.f32 1.442695, %v1629_v23 }
0x1052   :  { %3419 = vpow2.f32 %v1630_v27 }
0x1055   :  { %v1740_v28 = vpop.xlane.xlu1 %1739 }
0x1056   :  { %v1741_v29 = vsub.f32 %v1737_v40, %v1740_v28 }
0x1058   :  { %v1742_v31 = vmul.f32 1.442695, %v1741_v29 }
0x105a   :  { %3421 = vpow2.f32 %v1742_v31 }
0x105c   :  { %v3420_v32 = vpop.eup %3419 }
0x105d   :  { %v1852_v33 = vpop.xlane.xlu0 %1851  ;;  %v1632_v7 = vsel %vm149_vm2, %v3420_v32, 0.0 }
0x105e   :  { %v1853_v35 = vsub.f32 %v1849_v50, %v1852_v33  ;;  %1633 = vadd.xlane.f32.xlu1 %v1632_v7 }
0x1060   :  { %v1854_v36 = vmul.f32 1.442695, %v1853_v35 }
0x1062   :  { %3423 = vpow2.f32 %v1854_v36 }
0x1064   :  { %v3422_v37 = vpop.eup %3421 }
0x1065   :  { %v1744_v38 = vsel %vm149_vm2, %v3422_v37, 0.0  ;;  %v1978_v45 = vpop.xlane.xlu0 %1977 }
0x1066   :  { %1745 = vadd.xlane.f32.xlu0 %v1744_v38  ;;  %v1979_v46 = vsub.f32 %v1975_v61, %v1978_v45 }
0x1068   :  { %v1980_v49 = vmul.f32 1.442695, %v1979_v46 }
0x106a   :  { %3425 = vpow2.f32 %v1980_v49 }
0x106c   :  { %v4043_v39 = vpop.eup %3423 }
0x106d   :  { %v1856_v21 = vsel %vm149_vm2, %v4043_v39, 0.0  ;;  %v2090_v48 = vpop.xlane.xlu0 %2089 }
0x106e   :  { %1857 = vadd.xlane.f32.xlu1 %v1856_v21  ;;  %v2091_v50 = vsub.f32 %v2087_v63, %v2090_v48 }
0x1070   :  { %v2092_v54 = vmul.f32 1.442695, %v2091_v50 }
0x1072   :  { %3427 = vpow2.f32 %v2092_v54 }
0x1075   :  { %v2202_v40 = vpop.xlane.xlu1 %2201 }
0x1076   :  { %v2203_v53 = vsub.f32 %v2199_v6, %v2202_v40 }
0x1078   :  { %v2204_v42 = vmul.f32 1.442695, %v2203_v53 }
0x1079   :  { %v1639_v41 = vpop.permute.xlu1 %1638 }
0x107a   :  { %v1644_v43 = vsel %vm215_vm4, %v1639_v41, 0  ;;  %3429 = vpow2.f32 %v2204_v42 }
0x107b   :  { %3171 = vmatpush3.bf16.msra.mxu1 %v1644_v43 }
0x107c   :  { %1862 = vrot.lane.b32.xlu0 %v3936_v34, %s3492_s28  ;;  %3182 = vmatprep.subr.bf16.mxu1 %v3479_v15  ;;  %v3426_v34 = vpop.eup %3425 }
0x107d   :  { %v2314_v51 = vpop.xlane.xlu0 %2313  ;;  %v1982_v47 = vsel %vm149_vm2, %v3426_v34, 0.0  ;;  %v3428_v0 = vpop.eup %3427 }
0x107e   :  { %v2315_v57 = vsub.f32 %v2311_v17, %v2314_v51  ;;  %v2094_v61 = vsel %vm149_vm2, %v3428_v0, 0.0 }
0x107f   :  { %1988 = vrot.lane.b32.xlu1 %v3951_v26, %s3490_s26 }
0x1080   :  { %v2316_v60 = vmul.f32 1.442695, %v2315_v57 }
0x1081   :  { %v1751_v55 = vpop.permute.xlu0 %1750 }
0x1082   :  { %3431 = vpow2.f32 %v2316_v60  ;;  %v1756_v5 = vsel %vm215_vm4, %v1751_v55, 0 }
0x1084   :  { %v4054_v58 = vpop.eup %3429 }
0x1085   :  { %v2206_v52 = vsel %vm149_vm2, %v4054_v58, 0.0 }
0x108c   :  { %v4057_v62 = vpop.eup %3431 }
0x108d   :  { %v2318_v1 = vsel %vm149_vm2, %v4057_v62, 0.0 }
0x109b   :  { %1983 = vadd.xlane.f32.xlu0 %v1982_v47 }
0x109f   :  { %2095 = vadd.xlane.f32.xlu0 %v2094_v61 }
0x10a3   :  { %2207 = vadd.xlane.f32.xlu1 %v2206_v52  ;;  %2319 = vadd.xlane.f32.xlu0 %v2318_v1 }
0x10b4   :  { %2212 = vrot.lane.b32.xlu1 %v3951_v26, %s3491_s27 }
0x10b8   :  { %2324 = vrot.lane.b32.xlu1 %v3951_v26, %s3492_s28 }
0x10b9   :  { %2100 = vrot.lane.b32.xlu0 %v3951_v26, %s3488_s25 }
0x10eb   :  { %v1634_v63 = vpop.xlane.xlu1 %1633 }
0x10ec   :  { %3433 = vrcp.f32 %v1634_v63 }
0x10f3   :  { %v1746_v2 = vpop.xlane.xlu0 %1745 }
0x10f4   :  { %3435 = vrcp.f32 %v1746_v2 }
0x10f6   :  { %v3434_v3 = vpop.eup %3433 }
0x10f7   :  { %v1636_v4 = vmul.f32 %v3434_v3, %v3420_v32  ;;  %v1863_v9 = vpop.permute.xlu0 %1862  ;;  %v3357_v3 = vld [vmem:[%s4236_s3 + $0x10] sm:$0xff]  }
0x10f8   :  { %v1868_v11 = vsel %vm215_vm4, %v1863_v9, 0  ;;  %3249 = vmatpush3.bf16.msra.mxu0 %v3357_v3  ;;  %v3362_v3 = vld [vmem:[%s4238_s5 + $0x48] sm:$0xff]  }
0x10f9   :  { %v1637_v44 = vpack.c.bf16 %v1636_v4, %v1636_v4  ;;  %3250 = vmatprep.subr.bf16.mxu0 %v3479_v15 }
0x10fb   :  { %3173 = vmatmul.mubr.msk.bf16.vlgmr.msra.gmra.mrb[44].mxu1 %vm149_vm2, %v1637_v44  ;;  %v1858_v6 = vpop.xlane.xlu1 %1857 }
0x10fc   :  { %3437 = vrcp.f32 %v1858_v6  ;;  %3183 = vmatpush3.bf16.msra.mxu1 %v1756_v5  ;;  %3184 = vmatprep.mubr.msk.bf16.mxu1 %vm3480_vm1, %v3479_v15 }
0x10fd   :  { %3194 = vmatprep.subr.bf16.mxu1 %v3479_v15 }
0x10fe   :  { %v3436_v26 = vpop.eup %3435 }
0x10ff   :  { %v1748_v8 = vmul.f32 %v3436_v26, %v3422_v37  ;;  %v1989_v17 = vpop.permute.xlu1 %1988  ;;  %v3358_v26 = vld [vmem:[%s4236_s3 + $0x18] sm:$0xff]  }
0x1100   :  { %v1994_v22 = vsel %vm215_vm4, %v1989_v17, 0  ;;  %3251 = vmatpush3.bf16.msra.mxu0 %v3358_v26 }
0x1101   :  { %v1749_v10 = vpack.c.bf16 %v1748_v8, %v1748_v8  ;;  %3264 = vmatprep.subr.bf16.mxu0 %v3479_v15 }
0x1103   :  { %3185 = vmatmul.mubr.msk.bf16.vlgmr.msra.gmra.mrb[48].mxu1 %vm149_vm2, %v1749_v10 }
0x1104   :  { %3195 = vmatpush3.bf16.msra.mxu1 %v1868_v11  ;;  %3196 = vmatprep.mubr.msk.bf16.mxu1 %vm3480_vm1, %v3479_v15 }
0x1105   :  { %3206 = vmatprep.subr.bf16.mxu1 %v3479_v15 }
0x1106   :  { %v3438_v14 = vpop.eup %3437 }
0x1107   :  { %v1860_v16 = vmul.f32 %v3438_v14, %v4043_v39 }
0x1109   :  { %v1861_v20 = vpack.c.bf16 %v1860_v16, %v1860_v16 }
0x110b   :  { %3197 = vmatmul.mubr.msk.bf16.vlgmr.msra.gmra.mrb[52].mxu1 %vm149_vm2, %v1861_v20 }
0x110c   :  { %3207 = vmatpush3.bf16.msra.mxu1 %v1994_v22  ;;  %3208 = vmatprep.mubr.msk.bf16.mxu1 %vm3480_vm1, %v3479_v15 }
0x110d   :  { %3218 = vmatprep.subr.bf16.mxu1 %v3479_v15 }
0x1128   :  { %v1984_v23 = vpop.xlane.xlu0 %1983 }
0x1129   :  { %3439 = vrcp.f32 %v1984_v23 }
0x112c   :  { %v2096_v27 = vpop.xlane.xlu0 %2095 }
0x112d   :  { %3441 = vrcp.f32 %v2096_v27 }
0x1130   :  { %v2320_v28 = vpop.xlane.xlu0 %2319  ;;  %v2208_v29 = vpop.xlane.xlu1 %2207 }
0x1131   :  { %3443 = vrcp.f32 %v2208_v29 }
0x1132   :  { %3445 = vrcp.f32 %v2320_v28 }
0x1133   :  { %v3440_v31 = vpop.eup %3439 }
0x1134   :  { %v1986_v32 = vmul.f32 %v3440_v31, %v3426_v34  ;;  %v2101_v33 = vpop.permute.xlu0 %2100  ;;  %v2213_v38 = vpop.permute.xlu1 %2212 }
0x1135   :  { %v2106_v36 = vsel %vm215_vm4, %v2101_v33, 0  ;;  %v2218_v40 = vsel %vm215_vm4, %v2213_v38, 0 }
0x1136   :  { %v1987_v7 = vpack.c.bf16 %v1986_v32, %v1986_v32 }
0x1137   :  { %v3442_v35 = vpop.eup %3441 }
0x1138   :  { %3209 = vmatmul.mubr.msk.bf16.vlgmr.msra.gmra.mrb[56].mxu1 %vm149_vm2, %v1987_v7  ;;  %v2098_v37 = vmul.f32 %v3442_v35, %v3428_v0  ;;  %v2325_v43 = vpop.permute.xlu1 %2324 }
0x1139   :  { %3219 = vmatpush3.bf16.msra.mxu1 %v2106_v36  ;;  %3220 = vmatprep.mubr.msk.bf16.mxu1 %vm3480_vm1, %v3479_v15  ;;  %v2330_v48 = vsel %vm215_vm4, %v2325_v43, 0 }
0x113a   :  { %3230 = vmatprep.subr.bf16.mxu1 %v3479_v15  ;;  %v2099_v39 = vpack.c.bf16 %v2098_v37, %v2098_v37 }
0x113b   :  { %v3444_v21 = vpop.eup %3443 }
0x113c   :  { %v2210_v41 = vmul.f32 %v3444_v21, %v4054_v58  ;;  %v3446_v46 = vpop.eup %3445 }
0x113d   :  { %v2322_v49 = vmul.f32 %v3446_v46, %v4057_v62 }
0x113e   :  { %v2211_v45 = vpack.c.bf16 %v2210_v41, %v2210_v41 }
0x113f   :  { %v2323_v50 = vpack.c.bf16 %v2322_v49, %v2322_v49 }
0x1140   :  { %3221 = vmatmul.mubr.msk.bf16.vlgmr.msra.gmra.mrb[60].mxu1 %vm149_vm2, %v2099_v39 }
0x1141   :  { %3231 = vmatpush3.bf16.msra.mxu1 %v2218_v40  ;;  %3232 = vmatprep.mubr.msk.bf16.mxu1 %vm3480_vm1, %v3479_v15 }
0x1142   :  { %3242 = vmatprep.subr.bf16.mxu1 %v3479_v15 }
0x1148   :  { %3233 = vmatmul.mubr.msk.bf16.vlgmr.msra.gmra.mrb[64].mxu1 %vm149_vm2, %v2211_v45 }
0x1149   :  { %3243 = vmatpush3.bf16.msra.mxu1 %v2330_v48  ;;  %3244 = vmatprep.mubr.msk.bf16.mxu1 %vm3480_vm1, %v3479_v15 }
0x114a   :  { %3256 = vmatprep.subr.bf16.mxu1 %v3479_v15 }
0x1150   :  { %3245 = vmatmul.mubr.msk.bf16.vlgmr.msra.gmra.mrb[68].mxu1 %vm149_vm2, %v2323_v50 }
0x1151   :  { %3260 = vmatprep.mubr.msk.bf16.mxu1 %vm3480_vm1, %v3479_v15 }
0x11ce   :  { %v1680_v51 = vpop.f32.mrb[44].mxu1 }
0x11cf   :  { %v3174_v53 = vpop.f32.mrb[45].mxu1 }
0x11d0   :  { %v1683_v54 = vpop.f32.mrb[46].mxu1 }
0x11d1   :  { %v3175_v57 = vpop.f32.mrb[47].mxu1 }
0x11d6   :  { %v1792_v42 = vpop.f32.mrb[48].mxu1 }
0x11d7   :  { %v3186_v60 = vpop.f32.mrb[49].mxu1 }
0x11d8   :  { %v1795_v34 = vpop.f32.mrb[50].mxu1 }
0x11d9   :  { %v3187_v47 = vpop.f32.mrb[51].mxu1 }
0x11de   :  { %v1904_v0 = vpop.f32.mrb[52].mxu1 }
0x11df   :  { %v3198_v58 = vpop.f32.mrb[53].mxu1 }
0x11e0   :  { %v1907_v61 = vpop.f32.mrb[54].mxu1 }
0x11e1   :  { %v3199_v62 = vpop.f32.mrb[55].mxu1 }
0x120b   :  { %v2030_v52 = vpop.f32.mrb[56].mxu1 }
0x120c   :  { %v3210_v1 = vpop.f32.mrb[57].mxu1 }
0x120d   :  { %v2033_v63 = vpop.f32.mrb[58].mxu1 }
0x120e   :  { %v3211_v55 = vpop.f32.mrb[59].mxu1  ;;  %v3359_v63 = vld [vmem:[%s4237_s4 + $0x10] sm:$0xff]  }
0x120f   :  { %3257 = vmatpush3.bf16.msra.mxu1 %v3359_v63  ;;  %v3360_v55 = vld [vmem:[%s4237_s4 + $0x18] sm:$0xff]  }
0x1210   :  { %3258 = vmatprep.subr.bf16.mxu1 %v3479_v15 }
0x1213   :  { %v2142_v2 = vpop.f32.mrb[60].mxu1  ;;  %3259 = vmatpush3.bf16.msra.mxu1 %v3360_v55 }
0x1214   :  { %v3326_v4 = vpack.i.bf16 %v2142_v2, %v1680_v51  ;;  %v3222_v44 = vpop.f32.mrb[61].mxu1  ;;  %3284 = vmatprep.subr.bf16.mxu1 %v3479_v15  ;;  %v3361_v2 = vld [vmem:[%s4238_s5 + $0x40] sm:$0xff]  }
0x1215   :  { %v2145_v5 = vpop.f32.mrb[62].mxu1  ;;  %v3364_v44 = vld [vmem:[%s4238_s5 + $0x58] sm:$0xff]  }
0x1216   :  { %3327 = vrot.lane.b32.xlu1 %v3326_v4, %s3493_s29  ;;  %v3223_v6 = vpop.f32.mrb[63].mxu1  ;;  %v3363_v4 = vld [vmem:[%s4238_s5 + $0x50] sm:$0xff]   ;;  %v3365_v5 = vld [vmem:[%s4238_s5 + $0x60] sm:$0xff]  }
0x1217   :  { %v3366_v6 = vld [vmem:[%s4238_s5 + $0x68] sm:$0xff]  }
0x121b   :  { %v2254_v8 = vpop.f32.mrb[64].mxu1 }
0x121c   :  { %v3331_v9 = vpack.i.bf16 %v2254_v8, %v1792_v42  ;;  %v3234_v10 = vpop.f32.mrb[65].mxu1 }
0x121d   :  { %v2257_v11 = vpop.f32.mrb[66].mxu1 }
0x121e   :  { %3332 = vrot.lane.b32.xlu1 %v3331_v9, %s3494_s11  ;;  %v3235_v14 = vpop.f32.mrb[67].mxu1 }
0x1223   :  { %v2366_v16 = vpop.f32.mrb[68].mxu1 }
0x1224   :  { %v3336_v17 = vpack.i.bf16 %v2366_v16, %v1904_v0  ;;  %v3246_v20 = vpop.f32.mrb[69].mxu1 }
0x1225   :  { %v2369_v22 = vpop.f32.mrb[70].mxu1 }
0x1226   :  { %3337 = vrot.lane.b32.xlu1 %v3336_v17, %s3495_s13  ;;  %v3247_v23 = vpop.f32.mrb[71].mxu1  ;;  %v2484_v17 = vrot.slane %v3927_v12, %v3877_v19 }
0x1288   :  { %v3328_v27 = vpop.permute.xlu1 %3327 }
0x1289   :  { %v3330_v29 = vunpack.i.h.bf16 %v3328_v27  ;;  %v3329_v31 = vunpack.i.l.bf16 %v3328_v27 }
0x128b   :  { %v2384_v35 = vsel %vm149_vm2, %v2030_v52, %v3330_v29  ;;  %v1922_v36 = vsel %vm149_vm2, %v4021_v18, %v3329_v31  ;;  %v4129_v18 = vld [vmem:[%s4239_s6 + $0x4] sm:$0x7] }
0x128c   :  { %v2396_v45 = vrot.slane %v4129_v18, %v3584_v25 }
0x1290   :  { %v3333_v28 = vpop.permute.xlu1 %3332 }
0x1291   :  { %v3335_v32 = vunpack.i.h.bf16 %v3333_v28  ;;  %v3334_v33 = vunpack.i.l.bf16 %v3333_v28  ;;  %v2490_v28 = vrot.slane %v3927_v12, %v1175_v13  ;;  %v2502_v13 = vrot.slane %v4129_v18, %v3594_v30 }
0x1293   :  { %v2385_v39 = vsel %vm608_vm5, %v2384_v35, %v3335_v32  ;;  %v1923_v21 = vsel %vm608_vm5, %v1922_v36, %v3334_v33 }
0x1298   :  { %v3338_v7 = vpop.permute.xlu1 %3337 }
0x1299   :  { %v3340_v37 = vunpack.i.h.bf16 %v3338_v7  ;;  %v3339_v38 = vunpack.i.l.bf16 %v3338_v7  ;;  %v3367_v7 = vld [vmem:[%s4238_s5 + $0x70] sm:$0xff]  }
0x129b   :  { %v2386_v40 = vsel %vm610_vm6, %v2385_v39, %v3340_v37  ;;  %v1924_v41 = vsel %vm610_vm6, %v1923_v21, %v3339_v38 }
0x129c   :  { %v2387_v43 = vpack.c.bf16 %v2386_v40, %v1924_v41 }
0x129e   :  { %3253 = vmatmul.mubr.msk.bf16.vlgmr.msra.gmra.mrb[76].mxu0 %vm44_vm0, %v2387_v43  ;;  %v2582_v43 = vrot.slane %v4129_v18, %v3877_v19 }
0x129f   :  { %3280 = vmatprep.mubr.msk.bf16.mxu0 %vm3480_vm1, %v3479_v15  ;;  %3265 = vmatpush3.bf16.msra.mxu0 %v3361_v2 }
0x12a0   :  { %3266 = vmatprep.subr.bf16.mxu0 %v3479_v15 }
0x12a3   :  { %3267 = vmatpush3.bf16.msra.mxu0 %v3362_v3 }
0x12a4   :  { %3268 = vmatprep.subr.bf16.mxu0 %v3479_v15 }
0x12a7   :  { %3269 = vmatpush3.bf16.msra.mxu0 %v3363_v4 }
0x12a8   :  { %3270 = vmatprep.subr.bf16.mxu0 %v3479_v15 }
0x12ab   :  { %3271 = vmatpush3.bf16.msra.mxu0 %v3364_v44  ;;  %v2896_v44 = vld [vmem:[%s4234_s1 + $0x8] sm:$0xf]  ;;  %s3496_s1 = smov [#allocation2]  }
0x12ac   :  { %3272 = vmatprep.subr.bf16.mxu0 %v3479_v15  ;;  %s2789_s22 = sshll.u32 %s3496_s1, 4  ;;  %s2790_s22 = int_to_ptr.vmem [resolvable:$true] %s2789_s22 }
0x12ad   :  { %s3455_s23 = scalar_lea.vmem %s2790_s22, 256  ;;  %p3460_p1 = scmp.lt.s32.totalorder %s2790_s22, %s2790_s22 }
0x12ae   :  { %p3456_p0 = scmp.ne.s32.totalorder %s2790_s22, %s3455_s23  ;;  %p3461_p2 = scmp.lt.s32.totalorder %s3455_s23, %s3455_s23 }
0x12af   :  { %3273 = vmatpush3.bf16.msra.mxu0 %v3365_v5  ;;  %v2705_v5 = vrot.slane %v2896_v44, %v3584_v25 }
0x12b0   :  { %3274 = vmatprep.subr.bf16.mxu0 %v3479_v15  ;;  %p3462_p3 = por %p3461_p2, %p3460_p1 }
0x12b2   :  { %p3463_p4 = pnand %p3462_p3, %p3456_p0 }
0x12b3   :  { %3275 = vmatpush3.bf16.msra.mxu0 %v3366_v6 }
0x12b4   :  { %3276 = vmatprep.subr.bf16.mxu0 %v3479_v15 }
0x12b7   :  { %3277 = vmatpush3.bf16.msra.mxu0 %v3367_v7 }
0x12b8   :  { %3278 = vmatprep.subr.bf16.mxu0 %v3479_v15 }
0x12bb   :  { %3279 = vmatpush3.bf16.msra.mxu0 %v3368_v24 }
0x1371   :  { %v2446_v46 = vpop.f32.mrb[76].mxu0 }
0x1372   :  { %v2447_v48 = vadd.f32 %v2446_v46, %v2396_v45  ;;  %v3254_v49 = vpop.f32.mrb[77].mxu0 }
0x1373   :  { %v2449_v50 = vpop.f32.mrb[78].mxu0 }
0x1374   :  { %v4134_v51 = vadd.f32 %v2447_v48, %v3903_v56  ;;  %v2450_v53 = vadd.f32 %v2449_v50, %v2396_v45  ;;  %v3255_v54 = vpop.f32.mrb[79].mxu0 }
0x1376   :  { %v4137_v57 = vadd.f32 %v2450_v53, %v3906_v59  ;;  %v2455_v42 = vsel %vm44_vm0, %v4134_v51, 0.0 }
0x1377   :  { %2456 = vadd.xlane.f32.xlu0 %v2455_v42 }
0x1378   :  { %v2458_v60 = vsel %vm44_vm0, %v4137_v57, 0.0 }
0x1379   :  { %2459 = vadd.xlane.f32.xlu1 %v2458_v60 }
0x1404   :  { %v2457_v34 = vpop.xlane.xlu0 %2456 }
0x1405   :  { %v2461_v47 = vmul.f32 0.03125, %v2457_v34 }
0x1406   :  { %v2460_v0 = vpop.xlane.xlu1 %2459 }
0x1407   :  { %v2463_v58 = vsub.f32 %v4134_v51, %v2461_v47  ;;  %v2462_v56 = vmul.f32 0.03125, %v2460_v0 }
0x1409   :  { %v2464_v61 = vsub.f32 %v4137_v57, %v2462_v56  ;;  %v2465_v62 = vmul.f32 %v2463_v58, %v2463_v58 }
0x140b   :  { %v2467_v59 = vsel %vm44_vm0, %v2465_v62, 0.0  ;;  %v2466_v52 = vmul.f32 %v2464_v61, %v2464_v61 }
0x140c   :  { %2468 = vadd.xlane.f32.xlu0 %v2467_v59 }
0x140d   :  { %v2470_v1 = vsel %vm44_vm0, %v2466_v52, 0.0  ;;  %v3370_v52 = vld [vmem:[%s4240_s7 + $0x8] sm:$0xff]  }
0x1410   :  { %2471 = vadd.xlane.f32.xlu0 %v2470_v1 }
0x1499   :  { %v2469_v26 = vpop.xlane.xlu0 %2468 }
0x149a   :  { %v2473_v8 = vmul.f32 0.03125, %v2469_v26 }
0x149c   :  { %v2475_v9 = vadd.f32 1e-05, %v2473_v8 }
0x149d   :  { %v2472_v10 = vpop.xlane.xlu0 %2471 }
0x149e   :  { %3447 = vrsqrt.f32 %v2475_v9  ;;  %v2474_v11 = vmul.f32 0.03125, %v2472_v10  ;;  %v2711_v10 = vrot.slane %v2896_v44, %v3594_v30 }
0x14a0   :  { %v2476_v14 = vadd.f32 1e-05, %v2474_v11 }
0x14a2   :  { %3449 = vrsqrt.f32 %v2476_v14 }
0x14a8   :  { %v3448_v16 = vpop.eup %3447 }
0x14a9   :  { %v2479_v20 = vmul.f32 %v3448_v16, %v2463_v58 }
0x14ab   :  { %v2485_v23 = vmul.f32 %v2484_v17, %v2479_v20  ;;  %v2897_v20 = vld [vmem:[%s4241_s8] ss:$0 sm:$0xff] }
0x14ac   :  { %v3450_v22 = vpop.eup %3449 }
0x14ad   :  { %v2480_v27 = vmul.f32 %v3450_v22, %v2464_v61  ;;  %v2491_v31 = vadd.f32 %v2490_v28, %v2485_v23 }
0x14af   :  { %v2486_v29 = vmul.f32 %v2484_v17, %v2480_v27 }
0x14b1   :  { %v2492_v32 = vadd.f32 %v2490_v28, %v2486_v29 }
0x14b3   :  { %v2493_v33 = vpack.c.bf16 %v2492_v32, %v2491_v31 }
0x14b5   :  { %3261 = vmatmul.mubr.msk.bf16.vlgmr.msra.gmra.mrb[72].mxu1 %vm44_vm0, %v2493_v33 }
0x14b6   :  { %3288 = vmatprep.mubr.msk.bf16.mxu1 %vm3480_vm1, %v3479_v15 }
0x1588   :  { %v2552_v12 = vpop.f32.mrb[72].mxu1 }
0x1589   :  { %v2553_v35 = vadd.f32 %v2552_v12, %v2502_v13  ;;  %v3262_v36 = vpop.f32.mrb[73].mxu1 }
0x158a   :  { %v2555_v37 = vpop.f32.mrb[74].mxu1 }
0x158b   :  { %v2556_v38 = vadd.f32 %v2555_v37, %v2502_v13  ;;  %v3263_v39 = vpop.f32.mrb[75].mxu1  ;;  %v2559_v21 = vmax.f32 %v2553_v35, 0.0 }
0x158d   :  { %v2560_v40 = vmax.f32 %v2556_v38, 0.0 }
0x158f   :  { %v2561_v41 = vpack.c.bf16 %v2560_v40, %v2559_v21 }
0x1591   :  { %3281 = vmatmul.mubr.bf16.vlgmr.msra.gmra.mrb[80].mxu0 %v2561_v41 }
0x1664   :  { %v2665_v45 = vpop.f32.mrb[80].mxu0 }
0x1665   :  { %v2666_v46 = vadd.f32 %v2665_v45, %v2582_v43  ;;  %v3282_v48 = vpop.f32.mrb[81].mxu0 }
0x1666   :  { %v2668_v49 = vpop.f32.mrb[82].mxu0 }
0x1667   :  { %v2672_v50 = vadd.f32 %v2666_v46, %v4134_v51  ;;  %v2669_v53 = vadd.f32 %v2668_v49, %v2582_v43  ;;  %v3283_v54 = vpop.f32.mrb[83].mxu0 }
0x1669   :  { %v2673_v42 = vadd.f32 %v2669_v53, %v4137_v57  ;;  %v2676_v60 = vsel %vm44_vm0, %v2672_v50, 0.0  ;;  %v3369_v57 = vld [vmem:[%s4240_s7] sm:$0xff]  }
0x166a   :  { %2677 = vadd.xlane.f32.xlu0 %v2676_v60  ;;  %3285 = vmatpush3.bf16.msra.mxu1 %v3369_v57 }
0x166b   :  { %v2679_v34 = vsel %vm44_vm0, %v2673_v42, 0.0  ;;  %3286 = vmatprep.subr.bf16.mxu1 %v3479_v15 }
0x166c   :  { %2680 = vadd.xlane.f32.xlu1 %v2679_v34 }
0x166e   :  { %3287 = vmatpush3.bf16.msra.mxu1 %v3370_v52 }
0x16f7   :  { %v2678_v47 = vpop.xlane.xlu0 %2677 }
0x16f8   :  { %v2682_v0 = vmul.f32 0.03125, %v2678_v47 }
0x16f9   :  { %v2681_v58 = vpop.xlane.xlu1 %2680 }
0x16fa   :  { %v2684_v19 = vsub.f32 %v2672_v50, %v2682_v0  ;;  %v2683_v18 = vmul.f32 0.03125, %v2681_v58 }
0x16fc   :  { %v2685_v56 = vsub.f32 %v2673_v42, %v2683_v18  ;;  %v2686_v61 = vmul.f32 %v2684_v19, %v2684_v19 }
0x16fe   :  { %v2688_v62 = vsel %vm44_vm0, %v2686_v61, 0.0  ;;  %v2687_v51 = vmul.f32 %v2685_v56, %v2685_v56 }
0x16ff   :  { %2689 = vadd.xlane.f32.xlu0 %v2688_v62 }
0x1700   :  { %v2691_v59 = vsel %vm44_vm0, %v2687_v51, 0.0 }
0x1701   :  { %2692 = vadd.xlane.f32.xlu1 %v2691_v59 }
0x178c   :  { %v2690_v1 = vpop.xlane.xlu0 %2689 }
0x178d   :  { %v2694_v63 = vmul.f32 0.03125, %v2690_v1 }
0x178e   :  { %v2693_v55 = vpop.xlane.xlu1 %2692 }
0x178f   :  { %v2696_v2 = vadd.f32 1e-05, %v2694_v63  ;;  %v2695_v3 = vmul.f32 0.03125, %v2693_v55 }
0x1791   :  { %3451 = vrsqrt.f32 %v2696_v2  ;;  %v2697_v4 = vadd.f32 1e-05, %v2695_v3 }
0x1793   :  { %3453 = vrsqrt.f32 %v2697_v4 }
0x179b   :  { %v3452_v6 = vpop.eup %3451 }
0x179c   :  { %v2700_v26 = vmul.f32 %v3452_v6, %v2684_v19 }
0x179d   :  { %v3454_v8 = vpop.eup %3453 }
0x179e   :  { %v2706_v9 = vmul.f32 %v2705_v5, %v2700_v26  ;;  %v2701_v15 = vmul.f32 %v3454_v8, %v2685_v56 }
0x17a0   :  { %v2707_v11 = vmul.f32 %v2705_v5, %v2701_v15  ;;  %v2712_v14 = vadd.f32 %v2711_v10, %v2706_v9 }
0x17a2   :  { %v2713_v16 = vadd.f32 %v2711_v10, %v2707_v11 }
0x17a4   :  { %v2714_v17 = vpack.c.bf16 %v2713_v16, %v2712_v14 }
0x17a6   :  { %3289 = vmatmul.mubr.msk.bf16.vlgmr.msra.gmra.mrb[76].mxu1 %vm44_vm0, %v2714_v17 }
0x1879   :  { %v2775_v22 = vpop.f32.mrb[76].mxu1 }
0x187a   :  { %v2776_v25 = vadd.f32 %v2897_v20, %v2775_v22  ;;  %v3290_v23 = vpop.f32.mrb[77].mxu1 }
0x187b   :  { %v2778_v27 = vpop.f32.mrb[78].mxu1 }
0x187c   :  { %2782 = vst [vmem:[#allocation2] sm:$0xff] %v2776_v25  ;;  %v2779_v28 = vadd.f32 %v2897_v20, %v2778_v27  ;;  %v3291_v29 = vpop.f32.mrb[79].mxu1 }
0x187e   :  { %2783 = vst [vmem:[#allocation2 + $0x8] sm:$0xff] %v2779_v28 }
0x187f   :  { %3466 = shalt.err (!%p3463_p4)
}
0x1880   :  { %s3467_s25 = scalar_lea.hbm %s4242_s9, 256 }
0x1881   :  { %p3468_p5 = scmp.ne.s32.totalorder %s4242_s9, %s3467_s25  ;;  %p3471_p6 = scmp.lt.u32.totalorder %s3467_s25, %s4242_s9 }
0x1883   :  { %p3473_p7 = pnand %p3471_p6, %p3468_p5 }
0x1885   :  { %3476 = shalt.err (!%p3473_p7)
}
0x1886   :  { %s3497_s13 = smov 128  }
0x1887   :  { %2795 = dma.vmem_to_hbm [thread:$0]  %s2790_s22, 256, %s4242_s9, [#allocation3], %s3497_s13, %s3497_s13, %s3493_s29  }
0x1888   :  { %3477 = dma.done.wait [#allocation3], 256  }
0x1889   :  { %3478 = vsyncadd [#allocation3], 4294967040 }
0x188a   :  { %2799 = vsyncpa [#allocation3], 1 }

</bundles_post_ra>
